<compile_context>
chip_gen: v7x
topology: tpu7x:2x2x1
jax: 0.10.0
libtpu: 0.0.40
codegen_flags: <defaults>
</compile_context>

<pallas_src>
import functools

import jax
import jax.numpy as jnp
from jax.experimental import pallas as pl
from jax.experimental.pallas import tpu as pltpu


def _round_up(x, m):
    return (x + m - 1) // m * m


# ----------------------------------------------------------------------------
# Pallas kernel: single invocation, time loop inside (unrolled fori_loop),
# batched input-gate matmul + batched vocab projection on the MXU.
# ----------------------------------------------------------------------------
def _decoder_kernel(x_ref, wih_ref, whh_ref, b_ref, wout_ref, bout_ref,
                    out_ref, gx_scr, h_all_scr, *, num_steps, batch):
    """Shapes (time-major, flattened over (T, Bp)):
       x_ref    : (T*Bp, Ep)    bf16
       wih_ref  : (Ep, 4*Hp)    bf16
       whh_ref  : (Hp, 4*Hp)    bf16
       b_ref    : (1, 4*Hp)     f32   (b_ih + b_hh)
       wout_ref : (Hp, Vp)      bf16
       bout_ref : (1, Vp)       f32
       out_ref  : (T*Bp, Vp)    f32   logits
       gx_scr   : (T*Bp, 4*Hp)  f32   x @ W_ih^T + b for all steps
       h_all_scr: (T*Bp, Hp)    f32   hidden states for all steps
    """
    Hp = whh_ref.shape[0]

    # (1) Batched input->gates matmul for ALL time steps at once (M = T*Bp),
    #     bias folded into the same epilogue (not on the per-step path).
    gx_scr[...] = (
        jnp.dot(x_ref[...], wih_ref[...], preferred_element_type=jnp.float32)
        + b_ref[...])

    # (2) Sequential recurrence. h/c carried as values (vregs, f32); the only
    #     per-step matmul is the small (Bp, Hp) @ (Hp, 4Hp) bf16 hidden matmul.
    def step(t, carry):
        h_prev, c_prev = carry
        row = pl.multiple_of(t * batch, batch)       # sublane-aligned offset
        gates = (gx_scr[pl.ds(row, batch), :]
                 + jnp.dot(h_prev.astype(jnp.bfloat16), whh_ref[...],
                           preferred_element_type=jnp.float32))
        # PyTorch gate order: input, forget, cell(g), output.
        # Hp is a multiple of 128 -> every slice is lane-tile aligned (no XLU
        # relayout on the serial critical path).
        i_g = jax.nn.sigmoid(gates[:, 0 * Hp:1 * Hp])
        f_g = jax.nn.sigmoid(gates[:, 1 * Hp:2 * Hp])
        g_g = jnp.tanh(gates[:, 2 * Hp:3 * Hp])
        o_g = jax.nn.sigmoid(gates[:, 3 * Hp:4 * Hp])
        c_new = f_g * c_prev + i_g * g_g
        h_new = o_g * jnp.tanh(c_new)
        h_all_scr[pl.ds(row, batch), :] = h_new      # full-tile f32 store
        return (h_new, c_new)

    zeros = jnp.zeros((batch, Hp), jnp.float32)      # zero initial (h, c)
    jax.lax.fori_loop(0, num_steps, step, (zeros, zeros), unroll=True)

    # (3) Batched vocab projection over ALL time steps at once (M = T*Bp),
    #     output bias folded into the epilogue.
    out_ref[...] = (
        jnp.dot(h_all_scr[...].astype(jnp.bfloat16), wout_ref[...],
                preferred_element_type=jnp.float32)
        + bout_ref[...])


def decoder_lstm_pallas(x_2d, wih_t, whh_t, b, wout_t, bout, *, num_steps, batch):
    """x_2d: (T*Bp, Ep) bf16 time-major flattened inputs.
       Returns logits (T*Bp, Vp) f32."""
    TB, Ep = x_2d.shape
    Hp = whh_t.shape[0]
    Vp = wout_t.shape[1]

    grid_spec = pltpu.PrefetchScalarGridSpec(
        num_scalar_prefetch=0,
        grid=(1,),                      # whole sequence in one invocation
        in_specs=[
            pl.BlockSpec((TB, Ep), lambda i: (0, 0)),
            pl.BlockSpec((Ep, 4 * Hp), lambda i: (0, 0)),
            pl.BlockSpec((Hp, 4 * Hp), lambda i: (0, 0)),
            pl.BlockSpec((1, 4 * Hp), lambda i: (0, 0)),
            pl.BlockSpec((Hp, Vp), lambda i: (0, 0)),
            pl.BlockSpec((1, Vp), lambda i: (0, 0)),
        ],
        out_specs=pl.BlockSpec((TB, Vp), lambda i: (0, 0)),
        scratch_shapes=[
            pltpu.VMEM((TB, 4 * Hp), jnp.float32),   # gx for all steps
            pltpu.VMEM((TB, Hp), jnp.float32),       # h for all steps
        ],
    )

    kernel = functools.partial(_decoder_kernel, num_steps=num_steps, batch=batch)
    return pl.pallas_call(
        kernel,
        out_shape=jax.ShapeDtypeStruct((TB, Vp), jnp.float32),
        grid_spec=grid_spec,
        compiler_params=pltpu.CompilerParams(
            dimension_semantics=("arbitrary",)),     # sequential recurrence
    )(x_2d, wih_t, whh_t, b, wout_t, bout)


# ----------------------------------------------------------------------------
# One-time weight preparation (hoisted out of the per-call path).
# ----------------------------------------------------------------------------
def prepare_params(params):
    """PyTorch-layout params -> padded, transposed, bf16 kernel layout."""
    V, E = params["embed"].shape
    H = params["w_hh"].shape[1]
    Ep = _round_up(E, 128)
    Hp = _round_up(H, 128)
    Vp = _round_up(V, 128)

    def gate_mat(w, in_dim, in_pad):
        # (4H, in_dim) -> (in_pad, 4Hp) bf16; pad each gate block separately so
        # the kernel's Hp-wide gate slices stay correct. Zero padding keeps
        # padded hidden units at h = c = 0 exactly.
        w4 = w.reshape(4, H, in_dim)
        w4 = jnp.pad(w4, ((0, 0), (0, Hp - H), (0, in_pad - in_dim)))
        return w4.reshape(4 * Hp, in_pad).T.astype(jnp.bfloat16)

    bias = (params["b_ih"] + params["b_hh"]).reshape(4, H)
    bias = jnp.pad(bias, ((0, 0), (0, Hp - H))).reshape(1, 4 * Hp)

    wout_t = jnp.pad(params["w_out"], ((0, Vp - V), (0, Hp - H))).T     # (Hp, Vp)
    bout = jnp.pad(params["b_out"], (0, Vp - V)).reshape(1, Vp)

    return {
        "embed": jnp.pad(params["embed"], ((0, 0), (0, Ep - E))).astype(jnp.float32),
        "wih_t": gate_mat(params["w_ih"], E, Ep),                        # (Ep, 4Hp)
        "whh_t": gate_mat(params["w_hh"], H, Hp),                        # (Hp, 4Hp)
        "b": bias.astype(jnp.float32),                                   # (1, 4Hp)
        "wout_t": wout_t.astype(jnp.bfloat16),                           # (Hp, Vp)
        "bout": bout.astype(jnp.float32),                                # (1, Vp)
    }


# ----------------------------------------------------------------------------
# DecoderRNN.forward: embedding/concat glue in JAX, hot path in Pallas.
# ----------------------------------------------------------------------------
def decoder_rnn_forward(prepared, features, captions):
    """features: (B, E) f32, captions: (B, L) int32 -> logits (B, L, V)."""
    B, L = captions.shape
    E = features.shape[1]
    V = prepared["embed"].shape[0]
    Ep = prepared["wih_t"].shape[0]
    Vp = prepared["wout_t"].shape[1]
    Bp = _round_up(B, 8)                               # sublane-aligned batch

    # captions[:, :-1]; embed; prepend image feature at t=0 (batch-first)
    cap = captions[:, :-1]                                        # (B, L-1)
    emb = jnp.take(prepared["embed"], cap, axis=0)                # (B, L-1, Ep)
    feat = jnp.pad(features.astype(jnp.float32), ((0, 0), (0, Ep - E)))
    x = jnp.concatenate([feat[:, None, :], emb], axis=1)          # (B, T, Ep)
    T = x.shape[1]                                                # T = L

    # pad batch, go time-major and flatten (T, Bp) -> T*Bp, cast to bf16
    x = jnp.pad(x, ((0, Bp - B), (0, 0), (0, 0)))
    x_2d = jnp.transpose(x, (1, 0, 2)).reshape(T * Bp, Ep).astype(jnp.bfloat16)

    logits = decoder_lstm_pallas(
        x_2d, prepared["wih_t"], prepared["whh_t"], prepared["b"],
        prepared["wout_t"], prepared["bout"], num_steps=T, batch=Bp)

    # back to PyTorch batch-first layout, drop padding
    logits = logits.reshape(T, Bp, Vp)[:, :B, :V]
    # TODO(synk): for realistic vocab sizes, tile Vp in the projection (own
    # grid axis) and write logits batch-major directly so this HBM transpose
    # of the full logits tensor disappears.
    return jnp.transpose(logits, (1, 0, 2))                       # (B, T, V)


# ----------------------------------------------------------------------------
# Pure-JAX f32 reference (lax.scan LSTM) for correctness checking.
# ----------------------------------------------------------------------------
def decoder_rnn_reference(params, features, captions):
    cap = captions[:, :-1]
    emb = jnp.take(params["embed"], cap, axis=0)
    x = jnp.concatenate([features[:, None, :], emb], axis=1)      # (B, T, E)
    B, T, E = x.shape
    H = params["w_hh"].shape[1]

    def step(carry, x_t):
        h, c = carry
        gates = (x_t @ params["w_ih"].T + h @ params["w_hh"].T
                 + params["b_ih"] + params["b_hh"])
        i = jax.nn.sigmoid(gates[:, 0 * H:1 * H])
        f = jax.nn.sigmoid(gates[:, 1 * H:2 * H])
        g = jnp.tanh(gates[:, 2 * H:3 * H])
        o = jax.nn.sigmoid(gates[:, 3 * H:4 * H])
        c = f * c + i * g
        h = o * jnp.tanh(c)
        return (h, c), h

    h0 = jnp.zeros((B, H), jnp.float32)
    c0 = jnp.zeros((B, H), jnp.float32)
    _, hs = jax.lax.scan(step, (h0, c0), jnp.transpose(x, (1, 0, 2)))
    out = jnp.transpose(hs, (1, 0, 2))                            # (B, T, H)
    return out @ params["w_out"].T + params["b_out"]              # (B, T, V)


# ----------------------------------------------------------------------------
# Deterministic parameter construction (synthetic, no checkpoint).
# ----------------------------------------------------------------------------
def init_params(key, embed_size, hidden_size, vocab_size):
    ks = jax.random.split(key, 7)
    s = 0.1
    return {
        "embed": s * jax.random.normal(ks[0], (vocab_size, embed_size), jnp.float32),
        "w_ih":  s * jax.random.normal(ks[1], (4 * hidden_size, embed_size), jnp.float32),
        "w_hh":  s * jax.random.normal(ks[2], (4 * hidden_size, hidden_size), jnp.float32),
        "b_ih":  s * jax.random.normal(ks[3], (4 * hidden_size,), jnp.float32),
        "b_hh":  s * jax.random.normal(ks[4], (4 * hidden_size,), jnp.float32),
        "w_out": s * jax.random.normal(ks[5], (vocab_size, hidden_size), jnp.float32),
        "b_out": s * jax.random.normal(ks[6], (vocab_size,), jnp.float32),
    }

# TODO(synk): DecoderRNN.sample (greedy decode with python-side break on token 1)
# is a host-controlled loop and is not implemented as a kernel.


if __name__ == "__main__":
    # small shapes: batch=2, embed=32, hidden=32, vocab=128, caption length=8
    B, E, H, V, L = 2, 32, 32, 128, 8

    key = jax.random.PRNGKey(0)
    k_par, k_feat, k_cap = jax.random.split(key, 3)

    params = init_params(k_par, E, H, V)
    features = jax.random.normal(k_feat, (B, E), jnp.float32)
    captions = jax.random.randint(k_cap, (B, L), 0, V, jnp.int32)

    prepared = prepare_params(params)          # one-time, kernel-friendly layout
    fwd = jax.jit(decoder_rnn_forward)
    out = jax.block_until_ready(fwd(prepared, features, captions))

    ref = decoder_rnn_reference(params, features, captions)
    assert out.shape == (B, L, V), out.shape
    max_err = float(jnp.max(jnp.abs(out - ref)))
    # bf16 matmul operands (f32 accumulation) -> tolerance looser than pure-f32
    assert jnp.allclose(out, ref, atol=2e-2, rtol=2e-2), max_err

    print("KERNEL_OK")
</pallas_src>

<mosaic_0001>
module attributes {stable_mosaic.version = 11 : i64} {
  func.func @_decoder_kernel(%arg0: i32, %arg1: memref<64x128xbf16, #tpu.memory_space<vmem>>, %arg2: memref<128x512xbf16, #tpu.memory_space<vmem>>, %arg3: memref<128x512xbf16, #tpu.memory_space<vmem>>, %arg4: memref<1x512xf32, #tpu.memory_space<vmem>>, %arg5: memref<128x128xbf16, #tpu.memory_space<vmem>>, %arg6: memref<1x128xf32, #tpu.memory_space<vmem>>, %arg7: memref<64x128xf32, #tpu.memory_space<vmem>>, %arg8: memref<64x512xf32, #tpu.memory_space<vmem>>, %arg9: memref<64x128xf32, #tpu.memory_space<vmem>>) attributes {dimension_semantics = [#tpu.dimension_semantics<arbitrary>], iteration_bounds = array<i64: 1>, scalar_prefetch = 0 : i64, scratch_operands = 2 : i64, tpu.core_type = #tpu.core_type<tc>, window_params = [{pipeline_mode = #tpu.pipeline_mode<synchronous>, transform_indices = @transform_0, window_bounds = array<i64: 64, 128>}, {pipeline_mode = #tpu.pipeline_mode<synchronous>, transform_indices = @transform_1, window_bounds = array<i64: 128, 512>}, {pipeline_mode = #tpu.pipeline_mode<synchronous>, transform_indices = @transform_2, window_bounds = array<i64: 128, 512>}, {pipeline_mode = #tpu.pipeline_mode<synchronous>, transform_indices = @transform_3, window_bounds = array<i64: 1, 512>}, {pipeline_mode = #tpu.pipeline_mode<synchronous>, transform_indices = @transform_4, window_bounds = array<i64: 128, 128>}, {pipeline_mode = #tpu.pipeline_mode<synchronous>, transform_indices = @transform_5, window_bounds = array<i64: 1, 128>}, {pipeline_mode = #tpu.pipeline_mode<synchronous>, transform_indices = @transform_6, window_bounds = array<i64: 64, 128>}]} {
    %c0 = arith.constant 0 : index
    %c0_0 = arith.constant 0 : index
    %0 = vector.load %arg1[%c0, %c0_0] : memref<64x128xbf16, #tpu.memory_space<vmem>>, vector<64x128xbf16>
    %c0_1 = arith.constant 0 : index
    %c0_2 = arith.constant 0 : index
    %1 = vector.load %arg2[%c0_1, %c0_2] : memref<128x512xbf16, #tpu.memory_space<vmem>>, vector<128x512xbf16>
    %cst = arith.constant dense<0.000000e+00> : vector<64x512xf32>
    %2 = tpu.matmul %0, %1, %cst {dimension_numbers = #tpu.dot_dimension_numbers<[1], [0], [0], [1], [0, 0, 1, 1], [], []>} : vector<64x128xbf16>, vector<128x512xbf16>, vector<64x512xf32> -> vector<64x512xf32>
    %c0_3 = arith.constant 0 : index
    %c0_4 = arith.constant 0 : index
    %3 = vector.load %arg4[%c0_3, %c0_4] : memref<1x512xf32, #tpu.memory_space<vmem>>, vector<1x512xf32>
    %4 = vector.broadcast %3 : vector<1x512xf32> to vector<64x512xf32>
    %5 = arith.addf %2, %4 : vector<64x512xf32>
    %c0_5 = arith.constant 0 : index
    %c0_6 = arith.constant 0 : index
    %6 = vector.load %arg8[%c0_5, %c0_6] : memref<64x512xf32, #tpu.memory_space<vmem>>, vector<64x512xf32>
    tpu.vector_store %arg8[%c0_5, %c0_6], %5 {strides = array<i32>} : memref<64x512xf32, #tpu.memory_space<vmem>>, vector<64x512xf32>,
    %cst_7 = arith.constant 0.000000e+00 : f32
    %7 = vector.broadcast %cst_7 : f32 to vector<8x128xf32>
    %c0_i32 = arith.constant 0 : i32
    %c8_i32 = arith.constant 8 : i32
    %8 = arith.muli %c0_i32, %c8_i32 : i32
    %9 = tpu.assume_multiple %8, 8 : i32
    %10 = arith.index_cast %9 : i32 to index
    %c0_8 = arith.constant 0 : index
    %11 = vector.load %arg8[%10, %c0_8] : memref<64x512xf32, #tpu.memory_space<vmem>>, vector<8x512xf32>
    %12 = arith.truncf %7 : vector<8x128xf32> to vector<8x128xbf16>
    %c0_9 = arith.constant 0 : index
    %c0_10 = arith.constant 0 : index
    %13 = vector.load %arg3[%c0_9, %c0_10] : memref<128x512xbf16, #tpu.memory_space<vmem>>, vector<128x512xbf16>
    %cst_11 = arith.constant dense<0.000000e+00> : vector<8x512xf32>
    %14 = tpu.matmul %12, %13, %cst_11 {dimension_numbers = #tpu.dot_dimension_numbers<[1], [0], [0], [1], [0, 0, 1, 1], [], []>} : vector<8x128xbf16>, vector<128x512xbf16>, vector<8x512xf32> -> vector<8x512xf32>
    %15 = arith.addf %11, %14 : vector<8x512xf32>
    %16 = vector.extract_strided_slice %15 {offsets = [0, 0], sizes = [8, 128], strides = [1, 1]} : vector<8x512xf32> to vector<8x128xf32>
    %17 = arith.negf %16 : vector<8x128xf32>
    %18 = math.exp %17 : vector<8x128xf32>
    %cst_12 = arith.constant 1.000000e+00 : f32
    %19 = vector.broadcast %cst_12 : f32 to vector<8x128xf32>
    %20 = arith.addf %19, %18 : vector<8x128xf32>
    %21 = arith.divf %19, %20 : vector<8x128xf32>
    %22 = vector.extract_strided_slice %15 {offsets = [0, 128], sizes = [8, 128], strides = [1, 1]} : vector<8x512xf32> to vector<8x128xf32>
    %23 = arith.negf %22 : vector<8x128xf32>
    %24 = math.exp %23 : vector<8x128xf32>
    %cst_13 = arith.constant 1.000000e+00 : f32
    %25 = vector.broadcast %cst_13 : f32 to vector<8x128xf32>
    %26 = arith.addf %25, %24 : vector<8x128xf32>
    %27 = arith.divf %25, %26 : vector<8x128xf32>
    %28 = vector.extract_strided_slice %15 {offsets = [0, 256], sizes = [8, 128], strides = [1, 1]} : vector<8x512xf32> to vector<8x128xf32>
    %29 = math.tanh %28 : vector<8x128xf32>
    %30 = vector.extract_strided_slice %15 {offsets = [0, 384], sizes = [8, 128], strides = [1, 1]} : vector<8x512xf32> to vector<8x128xf32>
    %31 = arith.negf %30 : vector<8x128xf32>
    %32 = math.exp %31 : vector<8x128xf32>
    %cst_14 = arith.constant 1.000000e+00 : f32
    %33 = vector.broadcast %cst_14 : f32 to vector<8x128xf32>
    %34 = arith.addf %33, %32 : vector<8x128xf32>
    %35 = arith.divf %33, %34 : vector<8x128xf32>
    %36 = arith.mulf %27, %7 : vector<8x128xf32>
    %37 = arith.mulf %21, %29 : vector<8x128xf32>
    %38 = arith.addf %36, %37 : vector<8x128xf32>
    %39 = math.tanh %38 : vector<8x128xf32>
    %40 = arith.mulf %35, %39 : vector<8x128xf32>
    %41 = arith.index_cast %9 : i32 to index
    %c0_15 = arith.constant 0 : index
    %42 = vector.load %arg9[%41, %c0_15] : memref<64x128xf32, #tpu.memory_space<vmem>>, vector<8x128xf32>
    tpu.vector_store %arg9[%41, %c0_15], %40 {strides = array<i32>} : memref<64x128xf32, #tpu.memory_space<vmem>>, vector<8x128xf32>,
    %c1_i32 = arith.constant 1 : i32
    %c8_i32_16 = arith.constant 8 : i32
    %43 = arith.muli %c1_i32, %c8_i32_16 : i32
    %44 = tpu.assume_multiple %43, 8 : i32
    %45 = arith.index_cast %44 : i32 to index
    %c0_17 = arith.constant 0 : index
    %46 = vector.load %arg8[%45, %c0_17] : memref<64x512xf32, #tpu.memory_space<vmem>>, vector<8x512xf32>
    %47 = arith.truncf %40 : vector<8x128xf32> to vector<8x128xbf16>
    %c0_18 = arith.constant 0 : index
    %c0_19 = arith.constant 0 : index
    %48 = vector.load %arg3[%c0_18, %c0_19] : memref<128x512xbf16, #tpu.memory_space<vmem>>, vector<128x512xbf16>
    %cst_20 = arith.constant dense<0.000000e+00> : vector<8x512xf32>
    %49 = tpu.matmul %47, %48, %cst_20 {dimension_numbers = #tpu.dot_dimension_numbers<[1], [0], [0], [1], [0, 0, 1, 1], [], []>} : vector<8x128xbf16>, vector<128x512xbf16>, vector<8x512xf32> -> vector<8x512xf32>
    %50 = arith.addf %46, %49 : vector<8x512xf32>
    %51 = vector.extract_strided_slice %50 {offsets = [0, 0], sizes = [8, 128], strides = [1, 1]} : vector<8x512xf32> to vector<8x128xf32>
    %52 = arith.negf %51 : vector<8x128xf32>
    %53 = math.exp %52 : vector<8x128xf32>
    %cst_21 = arith.constant 1.000000e+00 : f32
    %54 = vector.broadcast %cst_21 : f32 to vector<8x128xf32>
    %55 = arith.addf %54, %53 : vector<8x128xf32>
    %56 = arith.divf %54, %55 : vector<8x128xf32>
    %57 = vector.extract_strided_slice %50 {offsets = [0, 128], sizes = [8, 128], strides = [1, 1]} : vector<8x512xf32> to vector<8x128xf32>
    %58 = arith.negf %57 : vector<8x128xf32>
    %59 = math.exp %58 : vector<8x128xf32>
    %cst_22 = arith.constant 1.000000e+00 : f32
    %60 = vector.broadcast %cst_22 : f32 to vector<8x128xf32>
    %61 = arith.addf %60, %59 : vector<8x128xf32>
    %62 = arith.divf %60, %61 : vector<8x128xf32>
    %63 = vector.extract_strided_slice %50 {offsets = [0, 256], sizes = [8, 128], strides = [1, 1]} : vector<8x512xf32> to vector<8x128xf32>
    %64 = math.tanh %63 : vector<8x128xf32>
    %65 = vector.extract_strided_slice %50 {offsets = [0, 384], sizes = [8, 128], strides = [1, 1]} : vector<8x512xf32> to vector<8x128xf32>
    %66 = arith.negf %65 : vector<8x128xf32>
    %67 = math.exp %66 : vector<8x128xf32>
    %cst_23 = arith.constant 1.000000e+00 : f32
    %68 = vector.broadcast %cst_23 : f32 to vector<8x128xf32>
    %69 = arith.addf %68, %67 : vector<8x128xf32>
    %70 = arith.divf %68, %69 : vector<8x128xf32>
    %71 = arith.mulf %62, %38 : vector<8x128xf32>
    %72 = arith.mulf %56, %64 : vector<8x128xf32>
    %73 = arith.addf %71, %72 : vector<8x128xf32>
    %74 = math.tanh %73 : vector<8x128xf32>
    %75 = arith.mulf %70, %74 : vector<8x128xf32>
    %76 = arith.index_cast %44 : i32 to index
    %c0_24 = arith.constant 0 : index
    %77 = vector.load %arg9[%76, %c0_24] : memref<64x128xf32, #tpu.memory_space<vmem>>, vector<8x128xf32>
    tpu.vector_store %arg9[%76, %c0_24], %75 {strides = array<i32>} : memref<64x128xf32, #tpu.memory_space<vmem>>, vector<8x128xf32>,
    %c2_i32 = arith.constant 2 : i32
    %c8_i32_25 = arith.constant 8 : i32
    %78 = arith.muli %c2_i32, %c8_i32_25 : i32
    %79 = tpu.assume_multiple %78, 8 : i32
    %80 = arith.index_cast %79 : i32 to index
    %c0_26 = arith.constant 0 : index
    %81 = vector.load %arg8[%80, %c0_26] : memref<64x512xf32, #tpu.memory_space<vmem>>, vector<8x512xf32>
    %82 = arith.truncf %75 : vector<8x128xf32> to vector<8x128xbf16>
    %c0_27 = arith.constant 0 : index
    %c0_28 = arith.constant 0 : index
    %83 = vector.load %arg3[%c0_27, %c0_28] : memref<128x512xbf16, #tpu.memory_space<vmem>>, vector<128x512xbf16>
    %cst_29 = arith.constant dense<0.000000e+00> : vector<8x512xf32>
    %84 = tpu.matmul %82, %83, %cst_29 {dimension_numbers = #tpu.dot_dimension_numbers<[1], [0], [0], [1], [0, 0, 1, 1], [], []>} : vector<8x128xbf16>, vector<128x512xbf16>, vector<8x512xf32> -> vector<8x512xf32>
    %85 = arith.addf %81, %84 : vector<8x512xf32>
    %86 = vector.extract_strided_slice %85 {offsets = [0, 0], sizes = [8, 128], strides = [1, 1]} : vector<8x512xf32> to vector<8x128xf32>
    %87 = arith.negf %86 : vector<8x128xf32>
    %88 = math.exp %87 : vector<8x128xf32>
    %cst_30 = arith.constant 1.000000e+00 : f32
    %89 = vector.broadcast %cst_30 : f32 to vector<8x128xf32>
    %90 = arith.addf %89, %88 : vector<8x128xf32>
    %91 = arith.divf %89, %90 : vector<8x128xf32>
    %92 = vector.extract_strided_slice %85 {offsets = [0, 128], sizes = [8, 128], strides = [1, 1]} : vector<8x512xf32> to vector<8x128xf32>
    %93 = arith.negf %92 : vector<8x128xf32>
    %94 = math.exp %93 : vector<8x128xf32>
    %cst_31 = arith.constant 1.000000e+00 : f32
    %95 = vector.broadcast %cst_31 : f32 to vector<8x128xf32>
    %96 = arith.addf %95, %94 : vector<8x128xf32>
    %97 = arith.divf %95, %96 : vector<8x128xf32>
    %98 = vector.extract_strided_slice %85 {offsets = [0, 256], sizes = [8, 128], strides = [1, 1]} : vector<8x512xf32> to vector<8x128xf32>
    %99 = math.tanh %98 : vector<8x128xf32>
    %100 = vector.extract_strided_slice %85 {offsets = [0, 384], sizes = [8, 128], strides = [1, 1]} : vector<8x512xf32> to vector<8x128xf32>
    %101 = arith.negf %100 : vector<8x128xf32>
    %102 = math.exp %101 : vector<8x128xf32>
    %cst_32 = arith.constant 1.000000e+00 : f32
    %103 = vector.broadcast %cst_32 : f32 to vector<8x128xf32>
    %104 = arith.addf %103, %102 : vector<8x128xf32>
    %105 = arith.divf %103, %104 : vector<8x128xf32>
    %106 = arith.mulf %97, %73 : vector<8x128xf32>
    %107 = arith.mulf %91, %99 : vector<8x128xf32>
    %108 = arith.addf %106, %107 : vector<8x128xf32>
    %109 = math.tanh %108 : vector<8x128xf32>
    %110 = arith.mulf %105, %109 : vector<8x128xf32>
    %111 = arith.index_cast %79 : i32 to index
    %c0_33 = arith.constant 0 : index
    %112 = vector.load %arg9[%111, %c0_33] : memref<64x128xf32, #tpu.memory_space<vmem>>, vector<8x128xf32>
    tpu.vector_store %arg9[%111, %c0_33], %110 {strides = array<i32>} : memref<64x128xf32, #tpu.memory_space<vmem>>, vector<8x128xf32>,
    %c3_i32 = arith.constant 3 : i32
    %c8_i32_34 = arith.constant 8 : i32
    %113 = arith.muli %c3_i32, %c8_i32_34 : i32
    %114 = tpu.assume_multiple %113, 8 : i32
    %115 = arith.index_cast %114 : i32 to index
    %c0_35 = arith.constant 0 : index
    %116 = vector.load %arg8[%115, %c0_35] : memref<64x512xf32, #tpu.memory_space<vmem>>, vector<8x512xf32>
    %117 = arith.truncf %110 : vector<8x128xf32> to vector<8x128xbf16>
    %c0_36 = arith.constant 0 : index
    %c0_37 = arith.constant 0 : index
    %118 = vector.load %arg3[%c0_36, %c0_37] : memref<128x512xbf16, #tpu.memory_space<vmem>>, vector<128x512xbf16>
    %cst_38 = arith.constant dense<0.000000e+00> : vector<8x512xf32>
    %119 = tpu.matmul %117, %118, %cst_38 {dimension_numbers = #tpu.dot_dimension_numbers<[1], [0], [0], [1], [0, 0, 1, 1], [], []>} : vector<8x128xbf16>, vector<128x512xbf16>, vector<8x512xf32> -> vector<8x512xf32>
    %120 = arith.addf %116, %119 : vector<8x512xf32>
    %121 = vector.extract_strided_slice %120 {offsets = [0, 0], sizes = [8, 128], strides = [1, 1]} : vector<8x512xf32> to vector<8x128xf32>
    %122 = arith.negf %121 : vector<8x128xf32>
    %123 = math.exp %122 : vector<8x128xf32>
    %cst_39 = arith.constant 1.000000e+00 : f32
    %124 = vector.broadcast %cst_39 : f32 to vector<8x128xf32>
    %125 = arith.addf %124, %123 : vector<8x128xf32>
    %126 = arith.divf %124, %125 : vector<8x128xf32>
    %127 = vector.extract_strided_slice %120 {offsets = [0, 128], sizes = [8, 128], strides = [1, 1]} : vector<8x512xf32> to vector<8x128xf32>
    %128 = arith.negf %127 : vector<8x128xf32>
    %129 = math.exp %128 : vector<8x128xf32>
    %cst_40 = arith.constant 1.000000e+00 : f32
    %130 = vector.broadcast %cst_40 : f32 to vector<8x128xf32>
    %131 = arith.addf %130, %129 : vector<8x128xf32>
    %132 = arith.divf %130, %131 : vector<8x128xf32>
    %133 = vector.extract_strided_slice %120 {offsets = [0, 256], sizes = [8, 128], strides = [1, 1]} : vector<8x512xf32> to vector<8x128xf32>
    %134 = math.tanh %133 : vector<8x128xf32>
    %135 = vector.extract_strided_slice %120 {offsets = [0, 384], sizes = [8, 128], strides = [1, 1]} : vector<8x512xf32> to vector<8x128xf32>
    %136 = arith.negf %135 : vector<8x128xf32>
    %137 = math.exp %136 : vector<8x128xf32>
    %cst_41 = arith.constant 1.000000e+00 : f32
    %138 = vector.broadcast %cst_41 : f32 to vector<8x128xf32>
    %139 = arith.addf %138, %137 : vector<8x128xf32>
    %140 = arith.divf %138, %139 : vector<8x128xf32>
    %141 = arith.mulf %132, %108 : vector<8x128xf32>
    %142 = arith.mulf %126, %134 : vector<8x128xf32>
    %143 = arith.addf %141, %142 : vector<8x128xf32>
    %144 = math.tanh %143 : vector<8x128xf32>
    %145 = arith.mulf %140, %144 : vector<8x128xf32>
    %146 = arith.index_cast %114 : i32 to index
    %c0_42 = arith.constant 0 : index
    %147 = vector.load %arg9[%146, %c0_42] : memref<64x128xf32, #tpu.memory_space<vmem>>, vector<8x128xf32>
    tpu.vector_store %arg9[%146, %c0_42], %145 {strides = array<i32>} : memref<64x128xf32, #tpu.memory_space<vmem>>, vector<8x128xf32>,
    %c4_i32 = arith.constant 4 : i32
    %c8_i32_43 = arith.constant 8 : i32
    %148 = arith.muli %c4_i32, %c8_i32_43 : i32
    %149 = tpu.assume_multiple %148, 8 : i32
    %150 = arith.index_cast %149 : i32 to index
    %c0_44 = arith.constant 0 : index
    %151 = vector.load %arg8[%150, %c0_44] : memref<64x512xf32, #tpu.memory_space<vmem>>, vector<8x512xf32>
    %152 = arith.truncf %145 : vector<8x128xf32> to vector<8x128xbf16>
    %c0_45 = arith.constant 0 : index
    %c0_46 = arith.constant 0 : index
    %153 = vector.load %arg3[%c0_45, %c0_46] : memref<128x512xbf16, #tpu.memory_space<vmem>>, vector<128x512xbf16>
    %cst_47 = arith.constant dense<0.000000e+00> : vector<8x512xf32>
    %154 = tpu.matmul %152, %153, %cst_47 {dimension_numbers = #tpu.dot_dimension_numbers<[1], [0], [0], [1], [0, 0, 1, 1], [], []>} : vector<8x128xbf16>, vector<128x512xbf16>, vector<8x512xf32> -> vector<8x512xf32>
    %155 = arith.addf %151, %154 : vector<8x512xf32>
    %156 = vector.extract_strided_slice %155 {offsets = [0, 0], sizes = [8, 128], strides = [1, 1]} : vector<8x512xf32> to vector<8x128xf32>
    %157 = arith.negf %156 : vector<8x128xf32>
    %158 = math.exp %157 : vector<8x128xf32>
    %cst_48 = arith.constant 1.000000e+00 : f32
    %159 = vector.broadcast %cst_48 : f32 to vector<8x128xf32>
    %160 = arith.addf %159, %158 : vector<8x128xf32>
    %161 = arith.divf %159, %160 : vector<8x128xf32>
    %162 = vector.extract_strided_slice %155 {offsets = [0, 128], sizes = [8, 128], strides = [1, 1]} : vector<8x512xf32> to vector<8x128xf32>
    %163 = arith.negf %162 : vector<8x128xf32>
    %164 = math.exp %163 : vector<8x128xf32>
    %cst_49 = arith.constant 1.000000e+00 : f32
    %165 = vector.broadcast %cst_49 : f32 to vector<8x128xf32>
    %166 = arith.addf %165, %164 : vector<8x128xf32>
    %167 = arith.divf %165, %166 : vector<8x128xf32>
    %168 = vector.extract_strided_slice %155 {offsets = [0, 256], sizes = [8, 128], strides = [1, 1]} : vector<8x512xf32> to vector<8x128xf32>
    %169 = math.tanh %168 : vector<8x128xf32>
    %170 = vector.extract_strided_slice %155 {offsets = [0, 384], sizes = [8, 128], strides = [1, 1]} : vector<8x512xf32> to vector<8x128xf32>
    %171 = arith.negf %170 : vector<8x128xf32>
    %172 = math.exp %171 : vector<8x128xf32>
    %cst_50 = arith.constant 1.000000e+00 : f32
    %173 = vector.broadcast %cst_50 : f32 to vector<8x128xf32>
    %174 = arith.addf %173, %172 : vector<8x128xf32>
    %175 = arith.divf %173, %174 : vector<8x128xf32>
    %176 = arith.mulf %167, %143 : vector<8x128xf32>
    %177 = arith.mulf %161, %169 : vector<8x128xf32>
    %178 = arith.addf %176, %177 : vector<8x128xf32>
    %179 = math.tanh %178 : vector<8x128xf32>
    %180 = arith.mulf %175, %179 : vector<8x128xf32>
    %181 = arith.index_cast %149 : i32 to index
    %c0_51 = arith.constant 0 : index
    %182 = vector.load %arg9[%181, %c0_51] : memref<64x128xf32, #tpu.memory_space<vmem>>, vector<8x128xf32>
    tpu.vector_store %arg9[%181, %c0_51], %180 {strides = array<i32>} : memref<64x128xf32, #tpu.memory_space<vmem>>, vector<8x128xf32>,
    %c5_i32 = arith.constant 5 : i32
    %c8_i32_52 = arith.constant 8 : i32
    %183 = arith.muli %c5_i32, %c8_i32_52 : i32
    %184 = tpu.assume_multiple %183, 8 : i32
    %185 = arith.index_cast %184 : i32 to index
    %c0_53 = arith.constant 0 : index
    %186 = vector.load %arg8[%185, %c0_53] : memref<64x512xf32, #tpu.memory_space<vmem>>, vector<8x512xf32>
    %187 = arith.truncf %180 : vector<8x128xf32> to vector<8x128xbf16>
    %c0_54 = arith.constant 0 : index
    %c0_55 = arith.constant 0 : index
    %188 = vector.load %arg3[%c0_54, %c0_55] : memref<128x512xbf16, #tpu.memory_space<vmem>>, vector<128x512xbf16>
    %cst_56 = arith.constant dense<0.000000e+00> : vector<8x512xf32>
    %189 = tpu.matmul %187, %188, %cst_56 {dimension_numbers = #tpu.dot_dimension_numbers<[1], [0], [0], [1], [0, 0, 1, 1], [], []>} : vector<8x128xbf16>, vector<128x512xbf16>, vector<8x512xf32> -> vector<8x512xf32>
    %190 = arith.addf %186, %189 : vector<8x512xf32>
    %191 = vector.extract_strided_slice %190 {offsets = [0, 0], sizes = [8, 128], strides = [1, 1]} : vector<8x512xf32> to vector<8x128xf32>
    %192 = arith.negf %191 : vector<8x128xf32>
    %193 = math.exp %192 : vector<8x128xf32>
    %cst_57 = arith.constant 1.000000e+00 : f32
    %194 = vector.broadcast %cst_57 : f32 to vector<8x128xf32>
    %195 = arith.addf %194, %193 : vector<8x128xf32>
    %196 = arith.divf %194, %195 : vector<8x128xf32>
    %197 = vector.extract_strided_slice %190 {offsets = [0, 128], sizes = [8, 128], strides = [1, 1]} : vector<8x512xf32> to vector<8x128xf32>
    %198 = arith.negf %197 : vector<8x128xf32>
    %199 = math.exp %198 : vector<8x128xf32>
    %cst_58 = arith.constant 1.000000e+00 : f32
    %200 = vector.broadcast %cst_58 : f32 to vector<8x128xf32>
    %201 = arith.addf %200, %199 : vector<8x128xf32>
    %202 = arith.divf %200, %201 : vector<8x128xf32>
    %203 = vector.extract_strided_slice %190 {offsets = [0, 256], sizes = [8, 128], strides = [1, 1]} : vector<8x512xf32> to vector<8x128xf32>
    %204 = math.tanh %203 : vector<8x128xf32>
    %205 = vector.extract_strided_slice %190 {offsets = [0, 384], sizes = [8, 128], strides = [1, 1]} : vector<8x512xf32> to vector<8x128xf32>
    %206 = arith.negf %205 : vector<8x128xf32>
    %207 = math.exp %206 : vector<8x128xf32>
    %cst_59 = arith.constant 1.000000e+00 : f32
    %208 = vector.broadcast %cst_59 : f32 to vector<8x128xf32>
    %209 = arith.addf %208, %207 : vector<8x128xf32>
    %210 = arith.divf %208, %209 : vector<8x128xf32>
    %211 = arith.mulf %202, %178 : vector<8x128xf32>
    %212 = arith.mulf %196, %204 : vector<8x128xf32>
    %213 = arith.addf %211, %212 : vector<8x128xf32>
    %214 = math.tanh %213 : vector<8x128xf32>
    %215 = arith.mulf %210, %214 : vector<8x128xf32>
    %216 = arith.index_cast %184 : i32 to index
    %c0_60 = arith.constant 0 : index
    %217 = vector.load %arg9[%216, %c0_60] : memref<64x128xf32, #tpu.memory_space<vmem>>, vector<8x128xf32>
    tpu.vector_store %arg9[%216, %c0_60], %215 {strides = array<i32>} : memref<64x128xf32, #tpu.memory_space<vmem>>, vector<8x128xf32>,
    %c6_i32 = arith.constant 6 : i32
    %c8_i32_61 = arith.constant 8 : i32
    %218 = arith.muli %c6_i32, %c8_i32_61 : i32
    %219 = tpu.assume_multiple %218, 8 : i32
    %220 = arith.index_cast %219 : i32 to index
    %c0_62 = arith.constant 0 : index
    %221 = vector.load %arg8[%220, %c0_62] : memref<64x512xf32, #tpu.memory_space<vmem>>, vector<8x512xf32>
    %222 = arith.truncf %215 : vector<8x128xf32> to vector<8x128xbf16>
    %c0_63 = arith.constant 0 : index
    %c0_64 = arith.constant 0 : index
    %223 = vector.load %arg3[%c0_63, %c0_64] : memref<128x512xbf16, #tpu.memory_space<vmem>>, vector<128x512xbf16>
    %cst_65 = arith.constant dense<0.000000e+00> : vector<8x512xf32>
    %224 = tpu.matmul %222, %223, %cst_65 {dimension_numbers = #tpu.dot_dimension_numbers<[1], [0], [0], [1], [0, 0, 1, 1], [], []>} : vector<8x128xbf16>, vector<128x512xbf16>, vector<8x512xf32> -> vector<8x512xf32>
    %225 = arith.addf %221, %224 : vector<8x512xf32>
    %226 = vector.extract_strided_slice %225 {offsets = [0, 0], sizes = [8, 128], strides = [1, 1]} : vector<8x512xf32> to vector<8x128xf32>
    %227 = arith.negf %226 : vector<8x128xf32>
    %228 = math.exp %227 : vector<8x128xf32>
    %cst_66 = arith.constant 1.000000e+00 : f32
    %229 = vector.broadcast %cst_66 : f32 to vector<8x128xf32>
    %230 = arith.addf %229, %228 : vector<8x128xf32>
    %231 = arith.divf %229, %230 : vector<8x128xf32>
    %232 = vector.extract_strided_slice %225 {offsets = [0, 128], sizes = [8, 128], strides = [1, 1]} : vector<8x512xf32> to vector<8x128xf32>
    %233 = arith.negf %232 : vector<8x128xf32>
    %234 = math.exp %233 : vector<8x128xf32>
    %cst_67 = arith.constant 1.000000e+00 : f32
    %235 = vector.broadcast %cst_67 : f32 to vector<8x128xf32>
    %236 = arith.addf %235, %234 : vector<8x128xf32>
    %237 = arith.divf %235, %236 : vector<8x128xf32>
    %238 = vector.extract_strided_slice %225 {offsets = [0, 256], sizes = [8, 128], strides = [1, 1]} : vector<8x512xf32> to vector<8x128xf32>
    %239 = math.tanh %238 : vector<8x128xf32>
    %240 = vector.extract_strided_slice %225 {offsets = [0, 384], sizes = [8, 128], strides = [1, 1]} : vector<8x512xf32> to vector<8x128xf32>
    %241 = arith.negf %240 : vector<8x128xf32>
    %242 = math.exp %241 : vector<8x128xf32>
    %cst_68 = arith.constant 1.000000e+00 : f32
    %243 = vector.broadcast %cst_68 : f32 to vector<8x128xf32>
    %244 = arith.addf %243, %242 : vector<8x128xf32>
    %245 = arith.divf %243, %244 : vector<8x128xf32>
    %246 = arith.mulf %237, %213 : vector<8x128xf32>
    %247 = arith.mulf %231, %239 : vector<8x128xf32>
    %248 = arith.addf %246, %247 : vector<8x128xf32>
    %249 = math.tanh %248 : vector<8x128xf32>
    %250 = arith.mulf %245, %249 : vector<8x128xf32>
    %251 = arith.index_cast %219 : i32 to index
    %c0_69 = arith.constant 0 : index
    %252 = vector.load %arg9[%251, %c0_69] : memref<64x128xf32, #tpu.memory_space<vmem>>, vector<8x128xf32>
    tpu.vector_store %arg9[%251, %c0_69], %250 {strides = array<i32>} : memref<64x128xf32, #tpu.memory_space<vmem>>, vector<8x128xf32>,
    %c7_i32 = arith.constant 7 : i32
    %c8_i32_70 = arith.constant 8 : i32
    %253 = arith.muli %c7_i32, %c8_i32_70 : i32
    %254 = tpu.assume_multiple %253, 8 : i32
    %255 = arith.index_cast %254 : i32 to index
    %c0_71 = arith.constant 0 : index
    %256 = vector.load %arg8[%255, %c0_71] : memref<64x512xf32, #tpu.memory_space<vmem>>, vector<8x512xf32>
    %257 = arith.truncf %250 : vector<8x128xf32> to vector<8x128xbf16>
    %c0_72 = arith.constant 0 : index
    %c0_73 = arith.constant 0 : index
    %258 = vector.load %arg3[%c0_72, %c0_73] : memref<128x512xbf16, #tpu.memory_space<vmem>>, vector<128x512xbf16>
    %cst_74 = arith.constant dense<0.000000e+00> : vector<8x512xf32>
    %259 = tpu.matmul %257, %258, %cst_74 {dimension_numbers = #tpu.dot_dimension_numbers<[1], [0], [0], [1], [0, 0, 1, 1], [], []>} : vector<8x128xbf16>, vector<128x512xbf16>, vector<8x512xf32> -> vector<8x512xf32>
    %260 = arith.addf %256, %259 : vector<8x512xf32>
    %261 = vector.extract_strided_slice %260 {offsets = [0, 0], sizes = [8, 128], strides = [1, 1]} : vector<8x512xf32> to vector<8x128xf32>
    %262 = arith.negf %261 : vector<8x128xf32>
    %263 = math.exp %262 : vector<8x128xf32>
    %cst_75 = arith.constant 1.000000e+00 : f32
    %264 = vector.broadcast %cst_75 : f32 to vector<8x128xf32>
    %265 = arith.addf %264, %263 : vector<8x128xf32>
    %266 = arith.divf %264, %265 : vector<8x128xf32>
    %267 = vector.extract_strided_slice %260 {offsets = [0, 128], sizes = [8, 128], strides = [1, 1]} : vector<8x512xf32> to vector<8x128xf32>
    %268 = arith.negf %267 : vector<8x128xf32>
    %269 = math.exp %268 : vector<8x128xf32>
    %cst_76 = arith.constant 1.000000e+00 : f32
    %270 = vector.broadcast %cst_76 : f32 to vector<8x128xf32>
    %271 = arith.addf %270, %269 : vector<8x128xf32>
    %272 = arith.divf %270, %271 : vector<8x128xf32>
    %273 = vector.extract_strided_slice %260 {offsets = [0, 256], sizes = [8, 128], strides = [1, 1]} : vector<8x512xf32> to vector<8x128xf32>
    %274 = math.tanh %273 : vector<8x128xf32>
    %275 = vector.extract_strided_slice %260 {offsets = [0, 384], sizes = [8, 128], strides = [1, 1]} : vector<8x512xf32> to vector<8x128xf32>
    %276 = arith.negf %275 : vector<8x128xf32>
    %277 = math.exp %276 : vector<8x128xf32>
    %cst_77 = arith.constant 1.000000e+00 : f32
    %278 = vector.broadcast %cst_77 : f32 to vector<8x128xf32>
    %279 = arith.addf %278, %277 : vector<8x128xf32>
    %280 = arith.divf %278, %279 : vector<8x128xf32>
    %281 = arith.mulf %272, %248 : vector<8x128xf32>
    %282 = arith.mulf %266, %274 : vector<8x128xf32>
    %283 = arith.addf %281, %282 : vector<8x128xf32>
    %284 = math.tanh %283 : vector<8x128xf32>
    %285 = arith.mulf %280, %284 : vector<8x128xf32>
    %286 = arith.index_cast %254 : i32 to index
    %c0_78 = arith.constant 0 : index
    %287 = vector.load %arg9[%286, %c0_78] : memref<64x128xf32, #tpu.memory_space<vmem>>, vector<8x128xf32>
    tpu.vector_store %arg9[%286, %c0_78], %285 {strides = array<i32>} : memref<64x128xf32, #tpu.memory_space<vmem>>, vector<8x128xf32>,
    %c8_i32_79 = arith.constant 8 : i32
    %c0_80 = arith.constant 0 : index
    %c0_81 = arith.constant 0 : index
    %288 = vector.load %arg9[%c0_80, %c0_81] : memref<64x128xf32, #tpu.memory_space<vmem>>, vector<64x128xf32>
    %289 = arith.truncf %288 : vector<64x128xf32> to vector<64x128xbf16>
    %c0_82 = arith.constant 0 : index
    %c0_83 = arith.constant 0 : index
    %290 = vector.load %arg5[%c0_82, %c0_83] : memref<128x128xbf16, #tpu.memory_space<vmem>>, vector<128x128xbf16>
    %cst_84 = arith.constant dense<0.000000e+00> : vector<64x128xf32>
    %291 = tpu.matmul %289, %290, %cst_84 {dimension_numbers = #tpu.dot_dimension_numbers<[1], [0], [0], [1], [0, 0, 1, 1], [], []>} : vector<64x128xbf16>, vector<128x128xbf16>, vector<64x128xf32> -> vector<64x128xf32>
    %c0_85 = arith.constant 0 : index
    %c0_86 = arith.constant 0 : index
    %292 = vector.load %arg6[%c0_85, %c0_86] : memref<1x128xf32, #tpu.memory_space<vmem>>, vector<1x128xf32>
    %293 = vector.broadcast %292 : vector<1x128xf32> to vector<64x128xf32>
    %294 = arith.addf %291, %293 : vector<64x128xf32>
    %c0_87 = arith.constant 0 : index
    %c0_88 = arith.constant 0 : index
    %295 = vector.load %arg7[%c0_87, %c0_88] : memref<64x128xf32, #tpu.memory_space<vmem>>, vector<64x128xf32>
    tpu.vector_store %arg7[%c0_87, %c0_88], %294 {strides = array<i32>} : memref<64x128xf32, #tpu.memory_space<vmem>>, vector<64x128xf32>,
    return
  }
  func.func @transform_0(%arg0: i32) -> (i32, i32) {
    %c0_i32 = arith.constant 0 : i32
    %c0_i32_0 = arith.constant 0 : i32
    %c0_i32_1 = arith.constant 0 : i32
    return %c0_i32, %c0_i32_0 : i32, i32
  }
  func.func @transform_1(%arg0: i32) -> (i32, i32) {
    %c0_i32 = arith.constant 0 : i32
    %c0_i32_0 = arith.constant 0 : i32
    %c0_i32_1 = arith.constant 0 : i32
    return %c0_i32, %c0_i32_0 : i32, i32
  }
  func.func @transform_2(%arg0: i32) -> (i32, i32) {
    %c0_i32 = arith.constant 0 : i32
    %c0_i32_0 = arith.constant 0 : i32
    %c0_i32_1 = arith.constant 0 : i32
    return %c0_i32, %c0_i32_0 : i32, i32
  }
  func.func @transform_3(%arg0: i32) -> (i32, i32) {
    %c0_i32 = arith.constant 0 : i32
    %c0_i32_0 = arith.constant 0 : i32
    %c0_i32_1 = arith.constant 0 : i32
    return %c0_i32, %c0_i32_0 : i32, i32
  }
  func.func @transform_4(%arg0: i32) -> (i32, i32) {
    %c0_i32 = arith.constant 0 : i32
    %c0_i32_0 = arith.constant 0 : i32
    %c0_i32_1 = arith.constant 0 : i32
    return %c0_i32, %c0_i32_0 : i32, i32
  }
  func.func @transform_5(%arg0: i32) -> (i32, i32) {
    %c0_i32 = arith.constant 0 : i32
    %c0_i32_0 = arith.constant 0 : i32
    %c0_i32_1 = arith.constant 0 : i32
    return %c0_i32, %c0_i32_0 : i32, i32
  }
  func.func @transform_6(%arg0: i32) -> (i32, i32) {
    %c0_i32 = arith.constant 0 : i32
    %c0_i32_0 = arith.constant 0 : i32
    %c0_i32_1 = arith.constant 0 : i32
    return %c0_i32, %c0_i32_0 : i32, i32
  }
}

</mosaic_0001>

<bundles_post_ra>
// kernel: decoder_rnn_forward.1
= control target key start
LH: loop header
LB: loop body
LE: loop exit
PB: predicated region body
PF: predicated region fallthrough
CT: control target
= control target key end

     0   :  { %11 = vsyncpa [#allocation5], 0  ;;  %s4656_s0 = inlined_call_operand.vmem [shape: bf16[64,128], index: 0, kind: input, shape index: {}]   ;;  %s4657_s1 = inlined_call_operand.vmem [shape: bf16[128,512], index: 1, kind: input, shape index: {}]   ;;  %s4658_s2 = inlined_call_operand.hbm [shape: bf16[128,512], index: 2, kind: input, shape index: {}]   ;;  %s4659_s3 = inlined_call_operand.vmem [shape: f32[1,512], index: 3, kind: input, shape index: {}]   ;;  %s4660_s4 = inlined_call_operand.hbm [shape: bf16[128,128], index: 4, kind: input, shape index: {}]   ;;  %s4661_s5 = inlined_call_operand.hbm [shape: f32[1,128], index: 5, kind: input, shape index: {}]   ;;  %s4662_s6 = inlined_call_operand.vmem [shape: f32[64,128], index: 6, kind: output, shape index: {}]  }
   0x1   :  { %12 = vsyncpa [#allocation7], 0  ;;  %s3897_s21 = smov [#allocation6]   ;;  %s3827_s25 = scalar_lea.hbm %s4660_s4, 1024 }
   0x2   :  { %s36_s22 = sshll.u32 %s3897_s21, 4  ;;  %p3828_p0 = scmp.ne.s32.totalorder %s4660_s4, %s3827_s25  ;;  %s37_s22 = int_to_ptr.vmem [resolvable:$true] %s36_s22 }
   0x3   :  { %p3831_p1 = scmp.lt.u32.totalorder %s3827_s25, %s4660_s4 }
   0x5   :  { %p3833_p2 = pnand %p3831_p1, %p3828_p0 }
   0x7   :  { %3836 = shalt.err (!%p3833_p2)
}
   0x8   :  { %s3837_s30 = scalar_lea.vmem %s37_s22, 1024  ;;  %p3842_p4 = scmp.lt.s32.totalorder %s37_s22, %s37_s22 }
   0x9   :  { %p3838_p3 = scmp.ne.s32.totalorder %s37_s22, %s3837_s30  ;;  %p3843_p5 = scmp.lt.s32.totalorder %s3837_s30, %s3837_s30 }
   0xb   :  { %p3844_p6 = por %p3843_p5, %p3842_p4 }
   0xd   :  { %p3845_p7 = pnand %p3844_p6, %p3838_p3 }
   0xf   :  { %3848 = shalt.err (!%p3845_p7)
}
  0x10   :  { %s3898_s7 = smov 64   ;;  %s3899_s8 = smov 4  }
  0x11   :  { %42 = dma.hbm_to_vmem [thread:$0]  %s4660_s4, 1024, %s37_s22, [#allocation7], %s3898_s7, %s3898_s7, %s3899_s8  }
  0x12   :  { %s3900_s11 = smov [#allocation4]   ;;  %s3849_s15 = scalar_lea.hbm %s4658_s2, 4096 }
  0x13   :  { %s22_s12 = sshll.u32 %s3900_s11, 4  ;;  %p3850_p8 = scmp.ne.s32.totalorder %s4658_s2, %s3849_s15  ;;  %s23_s12 = int_to_ptr.vmem [resolvable:$true] %s22_s12 }
  0x14   :  { %p3853_p9 = scmp.lt.u32.totalorder %s3849_s15, %s4658_s2 }
  0x16   :  { %p3855_p10 = pnand %p3853_p9, %p3850_p8 }
  0x18   :  { %3858 = shalt.err (!%p3855_p10)
}
  0x19   :  { %s3859_s20 = scalar_lea.vmem %s23_s12, 4096  ;;  %p3864_p12 = scmp.lt.s32.totalorder %s23_s12, %s23_s12 }
  0x1a   :  { %p3860_p11 = scmp.ne.s32.totalorder %s23_s12, %s3859_s20  ;;  %p3865_p13 = scmp.lt.s32.totalorder %s3859_s20, %s3859_s20 }
  0x1c   :  { %p3866_p0 = por %p3865_p13, %p3864_p12 }
  0x1e   :  { %p3867_p1 = pnand %p3866_p0, %p3860_p11 }
  0x20   :  { %3870 = shalt.err (!%p3867_p1)
}
  0x21   :  { %s3901_s4 = smov 256   ;;  %s3902_s21 = smov 16  }
  0x22   :  { %28 = dma.hbm_to_vmem [thread:$0]  %s4658_s2, 4096, %s23_s12, [#allocation5], %s3901_s4, %s3901_s4, %s3902_s21  }
  0x23   :  { %s3903_s24 = smov [#allocation8]   ;;  %s3871_s28 = scalar_lea.hbm %s4661_s5, 16 }
  0x24   :  { %s49_s25 = sshll.u32 %s3903_s24, 4  ;;  %p3872_p2 = scmp.ne.s32.totalorder %s4661_s5, %s3871_s28  ;;  %s50_s25 = int_to_ptr.vmem [resolvable:$true] %s49_s25 }
  0x25   :  { %p3875_p3 = scmp.lt.u32.totalorder %s3871_s28, %s4661_s5 }
  0x27   :  { %p3877_p4 = pnand %p3875_p3, %p3872_p2 }
  0x29   :  { %3880 = shalt.err (!%p3877_p4)
}
  0x2a   :  { %s3881_s9 = scalar_lea.vmem %s50_s25, 16  ;;  %s3885_s2 = scalar_lea.vmem %s50_s25, 32 }
  0x2b   :  { %p3882_p5 = scmp.ne.s32.totalorder %s50_s25, %s3881_s9  ;;  %p3886_p6 = scmp.lt.s32.totalorder %s50_s25, %s50_s25 }
  0x2c   :  { %p3887_p7 = scmp.lt.s32.totalorder %s3885_s2, %s3881_s9 }
  0x2e   :  { %p3888_p8 = por %p3887_p7, %p3886_p6 }
  0x30   :  { %p3889_p9 = pnand %p3888_p8, %p3882_p5 }
  0x32   :  { %3892 = shalt.err (!%p3889_p9)
}
  0x33   :  { %52 = dma.hbm_to_vmem [thread:$0]  %s4661_s5, 16, %s50_s25, [#allocation7]  }
  0x34   :  { %3893 = dma.done.wait [#allocation5], 4096  }
  0x35   :  { %3894 = vsyncadd [#allocation5], 4294963200 }
  0x36   :  { %3895 = dma.done.wait [#allocation7], 1040  }
  0x37   :  { %3896 = vsyncadd [#allocation7], 4294966256  ;;  %v4663_v0 = vmov 0   ;;  %v3519_v1 = vld [vmem:[%s4657_s1 + $0x4] ss:$16 sps:$4 sm:$0xff]   ;;  %v3574_v39 = vld [vmem:[%s4656_s0 + $0x8] sm:$0xff]  }
  0x38   :  { %341 = vmatprep.mubr.bf16.mxu1 %v4663_v0  ;;  %718 = vmatprep.mubr.bf16.mxu0 %v4663_v0  ;;  %v3521_v2 = vld [vmem:[%s4657_s1] ss:$16 sps:$4 sm:$0xff]   ;;  %v3984_v3 = vld [vmem:[#allocation4 + $0x4] ss:$16 sps:$4 sm:$0xff]   ;;  %v3570_v32 = vld [vmem:[%s4657_s1 + $0xc] ss:$16 sps:$4 sm:$0xff]  }
  0x39   :  { %309 = vmatprep.subr.bf16.mxu1 %v3519_v1  ;;  %v3986_v4 = vld [vmem:[#allocation4] ss:$16 sps:$4 sm:$0xff]   ;;  %v3525_v5 = vld [vmem:[%s4657_s1 + $0x24] ss:$16 sps:$4 sm:$0xff]   ;;  %686 = vmatprep.subr.bf16.mxu0 %v3984_v3  ;;  %v3568_v35 = vld [vmem:[%s4657_s1 + $0x8] ss:$16 sps:$4 sm:$0xff]  }
  0x3a   :  { %310 = vmatpush1.bf16.msra.mxu1 %v3521_v2  ;;  %v3527_v6 = vld [vmem:[%s4657_s1 + $0x20] ss:$16 sps:$4 sm:$0xff]   ;;  %v3995_v7 = vld [vmem:[#allocation4 + $0x24] ss:$16 sps:$4 sm:$0xff]   ;;  %687 = vmatpush1.bf16.msra.mxu0 %v3986_v4  ;;  %v3573_v36 = vld [vmem:[%s4657_s1 + $0x2c] ss:$16 sps:$4 sm:$0xff]  }
  0x3b   :  { %311 = vmatprep.subr.bf16.mxu1 %v3525_v5  ;;  %v3998_v8 = vld [vmem:[#allocation4 + $0x20] ss:$16 sps:$4 sm:$0xff]   ;;  %688 = vmatprep.subr.bf16.mxu0 %v3995_v7  ;;  %v3531_v9 = vld [vmem:[%s4657_s1 + $0x44] ss:$16 sps:$4 sm:$0xff]   ;;  %v3571_v37 = vld [vmem:[%s4657_s1 + $0x28] ss:$16 sps:$4 sm:$0xff]  }
  0x3c   :  { %v3533_v10 = vld [vmem:[%s4657_s1 + $0x40] ss:$16 sps:$4 sm:$0xff]   ;;  %v4007_v11 = vld [vmem:[#allocation4 + $0x44] ss:$16 sps:$4 sm:$0xff]   ;;  %v3577_v38 = vld [vmem:[%s4657_s1 + $0x4c] ss:$16 sps:$4 sm:$0xff]  }
  0x3d   :  { %v3537_v12 = vld [vmem:[%s4657_s1 + $0x64] ss:$16 sps:$4 sm:$0xff]   ;;  %v4013_v13 = vld [vmem:[#allocation4 + $0x40] ss:$16 sps:$4 sm:$0xff]   ;;  %v3575_v40 = vld [vmem:[%s4657_s1 + $0x48] ss:$16 sps:$4 sm:$0xff]  }
  0x3e   :  { %312 = vmatpush1.bf16.msra.mxu1 %v3527_v6  ;;  %689 = vmatpush1.bf16.msra.mxu0 %v3998_v8  ;;  %v4016_v14 = vld [vmem:[#allocation4 + $0x64] ss:$16 sps:$4 sm:$0xff]   ;;  %v3539_v15 = vld [vmem:[%s4657_s1 + $0x60] ss:$16 sps:$4 sm:$0xff]   ;;  %v3580_v41 = vld [vmem:[%s4657_s1 + $0x6c] ss:$16 sps:$4 sm:$0xff]  }
  0x3f   :  { %313 = vmatprep.subr.bf16.mxu1 %v3531_v9  ;;  %690 = vmatprep.subr.bf16.mxu0 %v4007_v11  ;;  %v3543_v16 = vld [vmem:[%s4657_s1 + $0x84] ss:$16 sps:$4 sm:$0xff]   ;;  %v4025_v17 = vld [vmem:[#allocation4 + $0x60] ss:$16 sps:$4 sm:$0xff]   ;;  %v3578_v42 = vld [vmem:[%s4657_s1 + $0x68] ss:$16 sps:$4 sm:$0xff]   ;;  %v105_v9 = vlaneseq }
  0x40   :  { %v4028_v18 = vld [vmem:[#allocation4 + $0x84] ss:$16 sps:$4 sm:$0xff]   ;;  %v3545_v19 = vld [vmem:[%s4657_s1 + $0x80] ss:$16 sps:$4 sm:$0xff]   ;;  %v3584_v43 = vld [vmem:[%s4657_s1 + $0x8c] ss:$16 sps:$4 sm:$0xff]  }
  0x41   :  { %v3549_v20 = vld [vmem:[%s4657_s1 + $0xa4] ss:$16 sps:$4 sm:$0xff]   ;;  %v4037_v21 = vld [vmem:[#allocation4 + $0x80] ss:$16 sps:$4 sm:$0xff]   ;;  %v3582_v45 = vld [vmem:[%s4657_s1 + $0x88] ss:$16 sps:$4 sm:$0xff]  }
  0x42   :  { %314 = vmatpush1.bf16.msra.mxu1 %v3533_v10  ;;  %691 = vmatpush1.bf16.msra.mxu0 %v4013_v13  ;;  %v4040_v22 = vld [vmem:[#allocation4 + $0xa4] ss:$16 sps:$4 sm:$0xff]   ;;  %v3551_v23 = vld [vmem:[%s4657_s1 + $0xa0] ss:$16 sps:$4 sm:$0xff]   ;;  %v3587_v46 = vld [vmem:[%s4657_s1 + $0xac] ss:$16 sps:$4 sm:$0xff]  }
  0x43   :  { %315 = vmatprep.subr.bf16.mxu1 %v3537_v12  ;;  %692 = vmatprep.subr.bf16.mxu0 %v4016_v14  ;;  %v3555_v24 = vld [vmem:[%s4657_s1 + $0xc4] ss:$16 sps:$4 sm:$0xff]   ;;  %v4049_v25 = vld [vmem:[#allocation4 + $0xa0] ss:$16 sps:$4 sm:$0xff]   ;;  %v3585_v47 = vld [vmem:[%s4657_s1 + $0xa8] ss:$16 sps:$4 sm:$0xff]  }
  0x44   :  { %v4052_v26 = vld [vmem:[#allocation4 + $0xc4] ss:$16 sps:$4 sm:$0xff]   ;;  %v3557_v27 = vld [vmem:[%s4657_s1 + $0xc0] ss:$16 sps:$4 sm:$0xff]   ;;  %v3591_v48 = vld [vmem:[%s4657_s1 + $0xcc] ss:$16 sps:$4 sm:$0xff]  }
  0x45   :  { %v3561_v28 = vld [vmem:[%s4657_s1 + $0xe4] ss:$16 sps:$4 sm:$0xff]   ;;  %v4061_v29 = vld [vmem:[#allocation4 + $0xc0] ss:$16 sps:$4 sm:$0xff]   ;;  %v3588_v49 = vld [vmem:[%s4656_s0 + $0x18] sm:$0xff]   ;;  %v106_v10 = vshrl.u32 %v105_v9, 7 }
  0x46   :  { %316 = vmatpush1.bf16.msra.mxu1 %v3539_v15  ;;  %693 = vmatpush1.bf16.msra.mxu0 %v4025_v17  ;;  %v4064_v30 = vld [vmem:[#allocation4 + $0xe4] ss:$16 sps:$4 sm:$0xff]   ;;  %v3563_v31 = vld [vmem:[%s4657_s1 + $0xe0] ss:$16 sps:$4 sm:$0xff]   ;;  %v3589_v50 = vld [vmem:[%s4657_s1 + $0xc8] ss:$16 sps:$4 sm:$0xff]  }
  0x47   :  { %317 = vmatprep.subr.bf16.mxu1 %v3543_v16  ;;  %694 = vmatprep.subr.bf16.mxu0 %v4028_v18  ;;  %v4073_v33 = vld [vmem:[#allocation4 + $0xe0] ss:$16 sps:$4 sm:$0xff]   ;;  %v3594_v51 = vld [vmem:[%s4657_s1 + $0xec] ss:$16 sps:$4 sm:$0xff]   ;;  %v3592_v52 = vld [vmem:[%s4657_s1 + $0xe8] ss:$16 sps:$4 sm:$0xff]  }
  0x48   :  { %v4079_v34 = vld [vmem:[%s4656_s0] sm:$0xff]   ;;  %v3581_v44 = vld [vmem:[%s4656_s0 + $0x10] sm:$0xff]   ;;  %v4154_v53 = vld [vmem:[#allocation4 + $0xc] ss:$16 sps:$4 sm:$0xff]   ;;  %v107_v12 = vsub.s32 0, %v106_v10  ;;  %v111_v16 = vsub.s32 1, %v106_v10 }
  0x49   :  { %v4158_v54 = vld [vmem:[#allocation4 + $0x8] ss:$16 sps:$4 sm:$0xff]   ;;  %v4161_v55 = vld [vmem:[#allocation4 + $0x2c] ss:$16 sps:$4 sm:$0xff]   ;;  %v103_v15 = vld [vmem:[%s4659_s3] sm:$0xf] }
  0x4a   :  { %318 = vmatpush1.bf16.msra.mxu1 %v3545_v19  ;;  %695 = vmatpush1.bf16.msra.mxu0 %v4037_v21  ;;  %v4165_v56 = vld [vmem:[#allocation4 + $0x28] ss:$16 sps:$4 sm:$0xff]   ;;  %v4173_v57 = vld [vmem:[#allocation4 + $0x4c] ss:$16 sps:$4 sm:$0xff]   ;;  %v108_v19 = vrot.slane %v103_v15, %v107_v12 }
  0x4b   :  { %319 = vmatprep.subr.bf16.mxu1 %v3549_v20  ;;  %696 = vmatprep.subr.bf16.mxu0 %v4040_v22  ;;  %v4176_v58 = vld [vmem:[#allocation4 + $0x48] ss:$16 sps:$4 sm:$0xff]   ;;  %v4179_v59 = vld [vmem:[#allocation4 + $0x6c] ss:$16 sps:$4 sm:$0xff]   ;;  %v112_v20 = vrot.slane %v103_v15, %v111_v16 }
  0x4c   :  { %v4182_v60 = vld [vmem:[#allocation4 + $0x68] ss:$16 sps:$4 sm:$0xff]   ;;  %v4186_v61 = vld [vmem:[#allocation4 + $0x8c] ss:$16 sps:$4 sm:$0xff]  }
  0x4d   :  { %v4189_v62 = vld [vmem:[#allocation4 + $0x88] ss:$16 sps:$4 sm:$0xff]   ;;  %v4192_v63 = vld [vmem:[#allocation4 + $0xac] ss:$16 sps:$4 sm:$0xff]  }
  0x4e   :  { %320 = vmatpush1.bf16.msra.mxu1 %v3551_v23  ;;  %697 = vmatpush1.bf16.msra.mxu0 %v4049_v25  ;;  %v4195_v1 = vld [vmem:[#allocation4 + $0xa8] ss:$16 sps:$4 sm:$0xff]   ;;  %v4199_v2 = vld [vmem:[#allocation4 + $0xcc] ss:$16 sps:$4 sm:$0xff]  }
  0x4f   :  { %321 = vmatprep.subr.bf16.mxu1 %v3555_v24  ;;  %698 = vmatprep.subr.bf16.mxu0 %v4052_v26  ;;  %v4205_v5 = vld [vmem:[#allocation4 + $0xec] ss:$16 sps:$4 sm:$0xff]   ;;  %v4208_v6 = vld [vmem:[#allocation4 + $0xe8] ss:$16 sps:$4 sm:$0xff]  }
  0x52   :  { %322 = vmatpush1.bf16.msra.mxu1 %v3557_v27  ;;  %699 = vmatpush1.bf16.msra.mxu0 %v4061_v29 }
  0x53   :  { %323 = vmatprep.subr.bf16.mxu1 %v3561_v28  ;;  %700 = vmatprep.subr.bf16.mxu0 %v4064_v30 }
  0x56   :  { %324 = vmatpush1.bf16.msra.mxu1 %v3563_v31  ;;  %701 = vmatpush1.bf16.msra.mxu0 %v4073_v33 }
  0x57   :  { %382 = vmatprep.subr.bf16.mxu1 %v3570_v32  ;;  %997 = vmatprep.subr.bf16.mxu0 %v3984_v3 }
  0x59   :  { %342 = vmatmul.mubr.bf16.vlgmr.msra.gmra.mrb[0].mxu1 %v4079_v34  ;;  %719 = vmatmul.mubr.bf16.vlgmr.msra.gmra.mrb[0].mxu0 %v4663_v0 }
  0x5a   :  { %383 = vmatpush1.bf16.msra.mxu1 %v3568_v35  ;;  %351 = vmatprep.mubr.bf16.mxu1 %v4663_v0 }
  0x5b   :  { %384 = vmatprep.subr.bf16.mxu1 %v3573_v36  ;;  %998 = vmatpush1.bf16.msra.mxu0 %v3986_v4 }
  0x5c   :  { %1029 = vmatprep.mubr.bf16.mxu0 %v4663_v0  ;;  %999 = vmatprep.subr.bf16.mxu0 %v3995_v7 }
  0x5e   :  { %385 = vmatpush1.bf16.msra.mxu1 %v3571_v37 }
  0x5f   :  { %386 = vmatprep.subr.bf16.mxu1 %v3577_v38  ;;  %1000 = vmatpush1.bf16.msra.mxu0 %v3998_v8 }
  0x60   :  { %1001 = vmatprep.subr.bf16.mxu0 %v4007_v11 }
  0x61   :  { %352 = vmatmul.mubr.bf16.gmra.mrb[4].mxu1 %v3574_v39 }
  0x62   :  { %387 = vmatpush1.bf16.msra.mxu1 %v3575_v40  ;;  %361 = vmatprep.mubr.bf16.mxu1 %v4663_v0 }
  0x63   :  { %388 = vmatprep.subr.bf16.mxu1 %v3580_v41  ;;  %1002 = vmatpush1.bf16.msra.mxu0 %v4013_v13 }
  0x64   :  { %1003 = vmatprep.subr.bf16.mxu0 %v4016_v14 }
  0x66   :  { %389 = vmatpush1.bf16.msra.mxu1 %v3578_v42 }
  0x67   :  { %390 = vmatprep.subr.bf16.mxu1 %v3584_v43  ;;  %1004 = vmatpush1.bf16.msra.mxu0 %v4025_v17 }
  0x68   :  { %1005 = vmatprep.subr.bf16.mxu0 %v4028_v18 }
  0x69   :  { %362 = vmatmul.mubr.bf16.gmra.mrb[8].mxu1 %v3581_v44 }
  0x6a   :  { %391 = vmatpush1.bf16.msra.mxu1 %v3582_v45  ;;  %371 = vmatprep.mubr.bf16.mxu1 %v4663_v0 }
  0x6b   :  { %392 = vmatprep.subr.bf16.mxu1 %v3587_v46  ;;  %1006 = vmatpush1.bf16.msra.mxu0 %v4037_v21 }
  0x6c   :  { %1007 = vmatprep.subr.bf16.mxu0 %v4040_v22 }
  0x6e   :  { %393 = vmatpush1.bf16.msra.mxu1 %v3585_v47 }
  0x6f   :  { %394 = vmatprep.subr.bf16.mxu1 %v3591_v48  ;;  %1008 = vmatpush1.bf16.msra.mxu0 %v4049_v25 }
  0x70   :  { %1009 = vmatprep.subr.bf16.mxu0 %v4052_v26 }
  0x71   :  { %372 = vmatmul.mubr.bf16.gmra.mrb[12].mxu1 %v3588_v49 }
  0x72   :  { %395 = vmatpush1.bf16.msra.mxu1 %v3589_v50  ;;  %414 = vmatprep.mubr.bf16.mxu1 %v4663_v0 }
  0x73   :  { %396 = vmatprep.subr.bf16.mxu1 %v3594_v51  ;;  %1010 = vmatpush1.bf16.msra.mxu0 %v4061_v29 }
  0x74   :  { %1011 = vmatprep.subr.bf16.mxu0 %v4064_v30 }
  0x76   :  { %397 = vmatpush1.bf16.msra.mxu1 %v3592_v52 }
  0x77   :  { %727 = vmatprep.subr.bf16.mxu1 %v4154_v53  ;;  %1012 = vmatpush1.bf16.msra.mxu0 %v4073_v33 }
  0x78   :  { %1309 = vmatprep.subr.bf16.mxu0 %v3984_v3  ;;  %v4202_v3 = vld [vmem:[#allocation4 + $0xc8] ss:$16 sps:$4 sm:$0xff]  }
  0x79   :  { %415 = vmatmul.mubr.bf16.vlgmr.msra.gmra.mrb[16].mxu1 %v4079_v34 }
  0x7a   :  { %728 = vmatpush1.bf16.msra.mxu1 %v4158_v54  ;;  %424 = vmatprep.mubr.bf16.mxu1 %v4663_v0 }
  0x7b   :  { %729 = vmatprep.subr.bf16.mxu1 %v4161_v55 }
  0x7e   :  { %730 = vmatpush1.bf16.msra.mxu1 %v4165_v56 }
  0x7f   :  { %731 = vmatprep.subr.bf16.mxu1 %v4173_v57 }
  0x81   :  { %425 = vmatmul.mubr.bf16.gmra.mrb[20].mxu1 %v3574_v39 }
  0x82   :  { %732 = vmatpush1.bf16.msra.mxu1 %v4176_v58  ;;  %434 = vmatprep.mubr.bf16.mxu1 %v4663_v0 }
  0x83   :  { %733 = vmatprep.subr.bf16.mxu1 %v4179_v59 }
  0x86   :  { %734 = vmatpush1.bf16.msra.mxu1 %v4182_v60 }
  0x87   :  { %735 = vmatprep.subr.bf16.mxu1 %v4186_v61 }
  0x89   :  { %435 = vmatmul.mubr.bf16.gmra.mrb[24].mxu1 %v3581_v44 }
  0x8a   :  { %736 = vmatpush1.bf16.msra.mxu1 %v4189_v62  ;;  %444 = vmatprep.mubr.bf16.mxu1 %v4663_v0 }
  0x8b   :  { %737 = vmatprep.subr.bf16.mxu1 %v4192_v63 }
  0x8e   :  { %738 = vmatpush1.bf16.msra.mxu1 %v4195_v1 }
  0x8f   :  { %739 = vmatprep.subr.bf16.mxu1 %v4199_v2 }
  0x91   :  { %445 = vmatmul.mubr.bf16.gmra.mrb[28].mxu1 %v3588_v49 }
  0x92   :  { %740 = vmatpush1.bf16.msra.mxu1 %v4202_v3  ;;  %759 = vmatprep.mubr.bf16.mxu1 %v4663_v0 }
  0x93   :  { %741 = vmatprep.subr.bf16.mxu1 %v4205_v5 }
  0x96   :  { %742 = vmatpush1.bf16.msra.mxu1 %v4208_v6 }
  0x97   :  { %1038 = vmatprep.subr.bf16.mxu1 %v4154_v53 }
  0x99   :  { %760 = vmatmul.mubr.bf16.vlgmr.msra.gmra.mrb[32].mxu1 %v4663_v0 }
  0x9a   :  { %1039 = vmatpush1.bf16.msra.mxu1 %v4158_v54  ;;  %1070 = vmatprep.mubr.bf16.mxu1 %v4663_v0 }
  0x9b   :  { %1040 = vmatprep.subr.bf16.mxu1 %v4161_v55 }
  0x9e   :  { %1041 = vmatpush1.bf16.msra.mxu1 %v4165_v56 }
  0x9f   :  { %1042 = vmatprep.subr.bf16.mxu1 %v4173_v57 }
  0xa2   :  { %1043 = vmatpush1.bf16.msra.mxu1 %v4176_v58 }
  0xa3   :  { %1044 = vmatprep.subr.bf16.mxu1 %v4179_v59 }
  0xa6   :  { %1045 = vmatpush1.bf16.msra.mxu1 %v4182_v60 }
  0xa7   :  { %1046 = vmatprep.subr.bf16.mxu1 %v4186_v61 }
  0xaa   :  { %1047 = vmatpush1.bf16.msra.mxu1 %v4189_v62 }
  0xab   :  { %1048 = vmatprep.subr.bf16.mxu1 %v4192_v63 }
  0xae   :  { %1049 = vmatpush1.bf16.msra.mxu1 %v4195_v1 }
  0xaf   :  { %1050 = vmatprep.subr.bf16.mxu1 %v4199_v2 }
  0xb2   :  { %1051 = vmatpush1.bf16.msra.mxu1 %v4202_v3 }
  0xb3   :  { %1052 = vmatprep.subr.bf16.mxu1 %v4205_v5 }
  0xb6   :  { %1053 = vmatpush1.bf16.msra.mxu1 %v4208_v6 }
  0xb7   :  { %1350 = vmatprep.subr.bf16.mxu1 %v4154_v53 }
 0x12c   :  { %v343_v23 = vpop.f32.mrb[0].mxu1  ;;  %v720_v32 = vpop.f32.mrb[0].mxu0 }
 0x12d   :  { %v344_v24 = vadd.f32 %v343_v23, %v108_v19  ;;  %v345_v27 = vpop.f32.mrb[1].mxu1  ;;  %v722_v37 = vpop.f32.mrb[1].mxu0 }
 0x12e   :  { %v346_v28 = vadd.f32 %v345_v27, %v112_v20  ;;  %v347_v31 = vpop.f32.mrb[2].mxu1  ;;  %v724_v40 = vpop.f32.mrb[2].mxu0 }
 0x12f   :  { %v4235_v34 = vadd.f32 %v347_v31, %v108_v19  ;;  %v768_v35 = vadd.f32 %v720_v32, %v344_v24  ;;  %v349_v36 = vpop.f32.mrb[3].mxu1  ;;  %v725_v41 = vpop.f32.mrb[3].mxu0 }
 0x130   :  { %v4237_v38 = vadd.f32 %v349_v36, %v112_v20  ;;  %v769_v39 = vadd.f32 %v722_v37, %v346_v28 }
 0x134   :  { %v353_v42 = vpop.f32.mrb[4].mxu1 }
 0x135   :  { %v4239_v43 = vadd.f32 %v353_v42, %v108_v19  ;;  %v355_v44 = vpop.f32.mrb[5].mxu1  ;;  %v115_v42 = vsub.s32 2, %v106_v10 }
 0x136   :  { %v4241_v45 = vadd.f32 %v355_v44, %v112_v20  ;;  %v357_v46 = vpop.f32.mrb[6].mxu1  ;;  %v119_v44 = vsub.s32 3, %v106_v10 }
 0x137   :  { %v4243_v47 = vadd.f32 %v357_v46, %v108_v19  ;;  %v359_v48 = vpop.f32.mrb[7].mxu1 }
 0x138   :  { %v4245_v49 = vadd.f32 %v359_v48, %v112_v20  ;;  %v116_v48 = vrot.slane %v103_v15, %v115_v42 }
 0x13c   :  { %v363_v50 = vpop.f32.mrb[8].mxu1 }
 0x13d   :  { %v4247_v51 = vadd.f32 %v363_v50, %v108_v19  ;;  %v365_v52 = vpop.f32.mrb[9].mxu1 }
 0x13e   :  { %v4249_v9 = vadd.f32 %v365_v52, %v112_v20  ;;  %v367_v12 = vpop.f32.mrb[10].mxu1  ;;  %v120_v52 = vrot.slane %v103_v15, %v119_v44  ;;  %v3218_v15 = vmul.f32 -1.442695, %v768_v35 }
 0x13f   :  { %4665 = vst [vmem:[#allocation11_spill] sm:$0xff] %v4247_v51  ;;  %v4251_v16 = vadd.f32 %v367_v12, %v108_v19  ;;  %v369_v23 = vpop.f32.mrb[11].mxu1 }
 0x140   :  { %4666 = vst [vmem:[#allocation12_spill] sm:$0xff] %v4249_v9  ;;  %v4253_v24 = vadd.f32 %v369_v23, %v112_v20 }
 0x141   :  { %4667 = vst [vmem:[#allocation13_spill] sm:$0xff] %v4251_v16 }
 0x142   :  { %4668 = vst [vmem:[#allocation14_spill] sm:$0xff] %v4253_v24 }
 0x144   :  { %v373_v27 = vpop.f32.mrb[12].mxu1 }
 0x145   :  { %v4255_v28 = vadd.f32 %v373_v27, %v108_v19  ;;  %v375_v31 = vpop.f32.mrb[13].mxu1 }
 0x146   :  { %v4257_v32 = vadd.f32 %v375_v31, %v112_v20  ;;  %v377_v36 = vpop.f32.mrb[14].mxu1 }
 0x147   :  { %4669 = vst [vmem:[#allocation15_spill] sm:$0xff] %v4255_v28  ;;  %v4259_v37 = vadd.f32 %v377_v36, %v108_v19  ;;  %v379_v40 = vpop.f32.mrb[15].mxu1 }
 0x148   :  { %4670 = vst [vmem:[#allocation16_spill] sm:$0xff] %v4257_v32  ;;  %v4261_v41 = vadd.f32 %v379_v40, %v112_v20 }
 0x149   :  { %4671 = vst [vmem:[#allocation17_spill] sm:$0xff] %v4259_v37 }
 0x14a   :  { %4672 = vst [vmem:[#allocation18_spill] sm:$0xff] %v4261_v41  ;;  %v3219_v41 = vmul.f32 -1.442695, %v769_v39 }
 0x14c   :  { %v416_v46 = vpop.f32.mrb[16].mxu1  ;;  %3699 = vpow2.f32 %v3219_v41 }
 0x14d   :  { %v418_v50 = vpop.f32.mrb[17].mxu1  ;;  %3701 = vpow2.f32 %v3218_v15 }
 0x14e   :  { %v420_v12 = vpop.f32.mrb[18].mxu1 }
 0x14f   :  { %v4263_v23 = vadd.f32 %v420_v12, %v116_v48  ;;  %v422_v27 = vpop.f32.mrb[19].mxu1 }
 0x150   :  { %v4265_v0 = vadd.f32 %v422_v27, %v120_v52 }
 0x154   :  { %v426_v31 = vpop.f32.mrb[20].mxu1 }
 0x155   :  { %v4267_v32 = vadd.f32 %v426_v31, %v116_v48  ;;  %v428_v19 = vpop.f32.mrb[21].mxu1 }
 0x156   :  { %v4269_v36 = vadd.f32 %v428_v19, %v120_v52  ;;  %v430_v20 = vpop.f32.mrb[22].mxu1 }
 0x157   :  { %v4271_v40 = vadd.f32 %v430_v20, %v116_v48  ;;  %v432_v10 = vpop.f32.mrb[23].mxu1 }
 0x158   :  { %v4273_v42 = vadd.f32 %v432_v10, %v120_v52  ;;  %v3700_v10 = vpop.eup %3699 }
 0x159   :  { %v3702_v15 = vpop.eup %3701 }
 0x15a   :  { %4673 = vst [vmem:[#allocation19_spill] sm:$0xff] %v4273_v42 }
 0x15c   :  { %v436_v44 = vpop.f32.mrb[24].mxu1 }
 0x15d   :  { %v4275_v12 = vadd.f32 %v436_v44, %v116_v48  ;;  %v438_v27 = vpop.f32.mrb[25].mxu1 }
 0x15e   :  { %v4277_v37 = vadd.f32 %v438_v27, %v120_v52  ;;  %v440_v31 = vpop.f32.mrb[26].mxu1 }
 0x15f   :  { %4674 = vst [vmem:[#allocation20_spill] sm:$0xff] %v4275_v12  ;;  %v4279_v28 = vadd.f32 %v440_v31, %v116_v48  ;;  %v442_v19 = vpop.f32.mrb[27].mxu1  ;;  %v775_v31 = vadd.f32 1.0, %v3702_v15  ;;  %v419_v12 = vadd.f32 %v418_v50, %v120_v52 }
 0x160   :  { %4675 = vst [vmem:[#allocation21_spill] sm:$0xff] %v4277_v37  ;;  %v4281_v24 = vadd.f32 %v442_v19, %v120_v52  ;;  %v781_v37 = vadd.f32 1.0, %v3700_v10 }
 0x161   :  { %4676 = vst [vmem:[#allocation22_spill] sm:$0xff] %v4279_v28  ;;  %v417_v28 = vadd.f32 %v416_v46, %v116_v48 }
 0x162   :  { %4677 = vst [vmem:[#allocation23_spill] sm:$0xff] %v4281_v24  ;;  %3703 = vrcp.f32 %v781_v37 }
 0x163   :  { %3705 = vrcp.f32 %v775_v31 }
 0x164   :  { %v446_v20 = vpop.f32.mrb[28].mxu1 }
 0x165   :  { %v4283_v16 = vadd.f32 %v446_v20, %v116_v48  ;;  %v448_v39 = vpop.f32.mrb[29].mxu1 }
 0x166   :  { %v4285_v35 = vadd.f32 %v448_v39, %v120_v52  ;;  %v450_v41 = vpop.f32.mrb[30].mxu1 }
 0x167   :  { %4678 = vst [vmem:[#allocation24_spill] sm:$0xff] %v4283_v16  ;;  %v4287_v44 = vadd.f32 %v450_v41, %v116_v48  ;;  %v452_v9 = vpop.f32.mrb[31].mxu1 }
 0x168   :  { %4679 = vst [vmem:[#allocation25_spill] sm:$0xff] %v4285_v35  ;;  %v4289_v27 = vadd.f32 %v452_v9, %v120_v52 }
 0x169   :  { %4680 = vst [vmem:[#allocation26_spill] sm:$0xff] %v4287_v44 }
 0x16a   :  { %4681 = vst [vmem:[#allocation27_spill] sm:$0xff] %v4289_v27 }
 0x16c   :  { %v761_v19 = vpop.f32.mrb[32].mxu1  ;;  %v3704_v41 = vpop.eup %3703 }
 0x16d   :  { %v770_v24 = vadd.f32 %v761_v19, %v417_v28  ;;  %v763_v20 = vpop.f32.mrb[33].mxu1  ;;  %v3706_v44 = vpop.eup %3705  ;;  %v791_v9 = vmul.f32 0.0, %v3704_v41 }
 0x16e   :  { %v771_v16 = vadd.f32 %v763_v20, %v419_v12  ;;  %v765_v51 = vpop.f32.mrb[34].mxu1 }
 0x16f   :  { %3707 = vtanh.f32 %v770_v24  ;;  %v766_v39 = vpop.f32.mrb[35].mxu1 }
 0x170   :  { %v3220_v35 = vmul.f32 -1.442695, %v771_v16  ;;  %v4682_v16 = vmov 0   ;;  %v4404_v39 = vld [vmem:[#allocation4 + $0xe0] ss:$16 sps:$4 sm:$0xff]  }
 0x172   :  { %3709 = vpow2.f32 %v3220_v35 }
 0x179   :  { %v3708_v42 = vpop.eup %3707 }
 0x17a   :  { %v792_v27 = vmul.f32 %v3708_v42, %v3706_v44 }
 0x17c   :  { %v3710_v10 = vpop.eup %3709  ;;  %v4291_v15 = vadd.f32 %v792_v27, %v791_v9 }
 0x17d   :  { %v788_v46 = vadd.f32 1.0, %v3710_v10 }
 0x17e   :  { %3711 = vtanh.f32 %v4291_v15 }
 0x17f   :  { %3713 = vrcp.f32 %v788_v46 }
 0x188   :  { %v3712_v28 = vpop.eup %3711 }
 0x189   :  { %v3714_v37 = vpop.eup %3713 }
 0x18a   :  { %v4294_v48 = vmul.f32 %v3714_v37, %v3712_v28 }
 0x18c   :  { %v804_v51 = vpack.c.bf16 %v4294_v48, %v4294_v48 }
 0x18e   :  { %1030 = vmatmul.mubr.bf16.vlgmr.msra.gmra.mrb[4].mxu0 %v804_v51  ;;  %1071 = vmatmul.mubr.bf16.vlgmr.msra.gmra.mrb[36].mxu1 %v804_v51 }
 0x18f   :  { %1310 = vmatpush1.bf16.msra.mxu0 %v3986_v4  ;;  %1351 = vmatpush1.bf16.msra.mxu1 %v4158_v54 }
 0x190   :  { %1311 = vmatprep.subr.bf16.mxu0 %v3995_v7  ;;  %1352 = vmatprep.subr.bf16.mxu1 %v4161_v55 }
 0x191   :  { %1341 = vmatprep.mubr.bf16.mxu0 %v4682_v16  ;;  %1382 = vmatprep.mubr.bf16.mxu1 %v4682_v16 }
 0x193   :  { %1312 = vmatpush1.bf16.msra.mxu0 %v3998_v8  ;;  %1353 = vmatpush1.bf16.msra.mxu1 %v4165_v56 }
 0x194   :  { %1313 = vmatprep.subr.bf16.mxu0 %v4007_v11  ;;  %1354 = vmatprep.subr.bf16.mxu1 %v4173_v57 }
 0x197   :  { %1314 = vmatpush1.bf16.msra.mxu0 %v4013_v13  ;;  %1355 = vmatpush1.bf16.msra.mxu1 %v4176_v58 }
 0x198   :  { %1315 = vmatprep.subr.bf16.mxu0 %v4016_v14  ;;  %1356 = vmatprep.subr.bf16.mxu1 %v4179_v59 }
 0x19b   :  { %1316 = vmatpush1.bf16.msra.mxu0 %v4025_v17  ;;  %1357 = vmatpush1.bf16.msra.mxu1 %v4182_v60 }
 0x19c   :  { %1317 = vmatprep.subr.bf16.mxu0 %v4028_v18  ;;  %1358 = vmatprep.subr.bf16.mxu1 %v4186_v61 }
 0x19f   :  { %1318 = vmatpush1.bf16.msra.mxu0 %v4037_v21  ;;  %1359 = vmatpush1.bf16.msra.mxu1 %v4189_v62 }
 0x1a0   :  { %1319 = vmatprep.subr.bf16.mxu0 %v4040_v22  ;;  %1360 = vmatprep.subr.bf16.mxu1 %v4192_v63 }
 0x1a3   :  { %1320 = vmatpush1.bf16.msra.mxu0 %v4049_v25  ;;  %1361 = vmatpush1.bf16.msra.mxu1 %v4195_v1 }
 0x1a4   :  { %1321 = vmatprep.subr.bf16.mxu0 %v4052_v26  ;;  %1362 = vmatprep.subr.bf16.mxu1 %v4199_v2 }
 0x1a7   :  { %1322 = vmatpush1.bf16.msra.mxu0 %v4061_v29  ;;  %1363 = vmatpush1.bf16.msra.mxu1 %v4202_v3 }
 0x1a8   :  { %1323 = vmatprep.subr.bf16.mxu0 %v4064_v30  ;;  %1364 = vmatprep.subr.bf16.mxu1 %v4205_v5 }
 0x1ab   :  { %1324 = vmatpush1.bf16.msra.mxu0 %v4073_v33  ;;  %1365 = vmatpush1.bf16.msra.mxu1 %v4208_v6 }
 0x1ac   :  { %1662 = vmatprep.subr.bf16.mxu1 %v4154_v53 }
 0x261   :  { %v1031_v4 = vpop.f32.mrb[4].mxu0  ;;  %v1072_v7 = vpop.f32.mrb[36].mxu1 }
 0x262   :  { %v1079_v8 = vadd.f32 %v1031_v4, %v4235_v34  ;;  %v1081_v11 = vadd.f32 %v1072_v7, %v4263_v23  ;;  %v1033_v13 = vpop.f32.mrb[5].mxu0  ;;  %v1074_v14 = vpop.f32.mrb[37].mxu1 }
 0x263   :  { %v1080_v17 = vadd.f32 %v1033_v13, %v4237_v38  ;;  %v1082_v18 = vadd.f32 %v1074_v14, %v4265_v0  ;;  %v1035_v21 = vpop.f32.mrb[6].mxu0  ;;  %v1076_v22 = vpop.f32.mrb[38].mxu1 }
 0x264   :  { %v3253_v25 = vmul.f32 -1.442695, %v1079_v8  ;;  %v1036_v26 = vpop.f32.mrb[7].mxu0  ;;  %v1077_v29 = vpop.f32.mrb[39].mxu1 }
 0x265   :  { %v3254_v30 = vmul.f32 -1.442695, %v1080_v17  ;;  %v3255_v33 = vmul.f32 -1.442695, %v1082_v18 }
 0x266   :  { %3715 = vpow2.f32 %v3253_v25 }
 0x267   :  { %3717 = vpow2.f32 %v3254_v30 }
 0x268   :  { %3719 = vpow2.f32 %v3255_v33 }
 0x269   :  { %3721 = vtanh.f32 %v1081_v11 }
 0x270   :  { %v3716_v53 = vpop.eup %3715 }
 0x271   :  { %v3718_v24 = vpop.eup %3717  ;;  %v1086_v34 = vadd.f32 1.0, %v3716_v53 }
 0x272   :  { %v1092_v50 = vadd.f32 1.0, %v3718_v24  ;;  %v3720_v38 = vpop.eup %3719 }
 0x273   :  { %3723 = vrcp.f32 %v1086_v34  ;;  %v3722_v52 = vpop.eup %3721  ;;  %v1099_v12 = vadd.f32 1.0, %v3720_v38  ;;  %v4439_v38 = vld [vmem:[#allocation4 + $0xc] ss:$16 sps:$4 sm:$0xff]  }
 0x274   :  { %3725 = vrcp.f32 %v1092_v50 }
 0x275   :  { %3727 = vrcp.f32 %v1099_v12  ;;  %v4453_v12 = vld [vmem:[#allocation4 + $0x48] ss:$16 sps:$4 sm:$0xff]  }
 0x27d   :  { %v3724_v0 = vpop.eup %3723 }
 0x27e   :  { %v3726_v23 = vpop.eup %3725  ;;  %v1103_v42 = vmul.f32 %v3724_v0, %v3722_v52  ;;  %v4441_v52 = vld [vmem:[#allocation4 + $0x8] ss:$16 sps:$4 sm:$0xff]   ;;  %v4445_v0 = vld [vmem:[#allocation4 + $0x2c] ss:$16 sps:$4 sm:$0xff]  }
 0x27f   :  { %v1102_v35 = vmul.f32 %v3726_v23, %v4291_v15  ;;  %v3728_v27 = vpop.eup %3727  ;;  %v4447_v23 = vld [vmem:[#allocation4 + $0x28] ss:$16 sps:$4 sm:$0xff]  }
 0x281   :  { %v4336_v44 = vadd.f32 %v1103_v42, %v1102_v35  ;;  %v4451_v42 = vld [vmem:[#allocation4 + $0x4c] ss:$16 sps:$4 sm:$0xff]  }
 0x282   :  { %v4457_v35 = vld [vmem:[#allocation4 + $0x6c] ss:$16 sps:$4 sm:$0xff]  }
 0x283   :  { %3729 = vtanh.f32 %v4336_v44 }
 0x28d   :  { %v3730_v31 = vpop.eup %3729 }
 0x28e   :  { %v4339_v19 = vmul.f32 %v3730_v31, %v3728_v27  ;;  %v4463_v27 = vld [vmem:[#allocation4 + $0x8c] ss:$16 sps:$4 sm:$0xff]   ;;  %v4465_v31 = vld [vmem:[#allocation4 + $0x88] ss:$16 sps:$4 sm:$0xff]  }
 0x290   :  { %v1116_v20 = vpack.c.bf16 %v4339_v19, %v4339_v19 }
 0x292   :  { %1342 = vmatmul.mubr.bf16.vlgmr.msra.gmra.mrb[8].mxu0 %v1116_v20  ;;  %1383 = vmatmul.mubr.bf16.vlgmr.msra.gmra.mrb[40].mxu1 %v1116_v20  ;;  %v4468_v20 = vld [vmem:[#allocation4 + $0xac] ss:$16 sps:$4 sm:$0xff]  }
 0x293   :  { %1663 = vmatpush1.bf16.msra.mxu1 %v4158_v54  ;;  %1653 = vmatprep.mubr.bf16.mxu0 %v4682_v16  ;;  %v4360_v54 = vld [vmem:[#allocation4 + $0x4] ss:$16 sps:$4 sm:$0xff]  }
 0x294   :  { %1664 = vmatprep.subr.bf16.mxu1 %v4161_v55  ;;  %1694 = vmatprep.mubr.bf16.mxu1 %v4682_v16  ;;  %v4362_v55 = vld [vmem:[#allocation4] ss:$16 sps:$4 sm:$0xff]  }
 0x295   :  { %1621 = vmatprep.subr.bf16.mxu0 %v4360_v54 }
 0x296   :  { %1622 = vmatpush1.bf16.msra.mxu0 %v4362_v55 }
 0x297   :  { %1665 = vmatpush1.bf16.msra.mxu1 %v4165_v56  ;;  %v4366_v56 = vld [vmem:[#allocation4 + $0x24] ss:$16 sps:$4 sm:$0xff]  }
 0x298   :  { %1666 = vmatprep.subr.bf16.mxu1 %v4173_v57  ;;  %v4368_v57 = vld [vmem:[#allocation4 + $0x20] ss:$16 sps:$4 sm:$0xff]   ;;  %1623 = vmatprep.subr.bf16.mxu0 %v4366_v56 }
 0x29a   :  { %1624 = vmatpush1.bf16.msra.mxu0 %v4368_v57 }
 0x29b   :  { %1667 = vmatpush1.bf16.msra.mxu1 %v4176_v58  ;;  %v4372_v58 = vld [vmem:[#allocation4 + $0x44] ss:$16 sps:$4 sm:$0xff]  }
 0x29c   :  { %1668 = vmatprep.subr.bf16.mxu1 %v4179_v59  ;;  %v4374_v59 = vld [vmem:[#allocation4 + $0x40] ss:$16 sps:$4 sm:$0xff]   ;;  %1625 = vmatprep.subr.bf16.mxu0 %v4372_v58 }
 0x29e   :  { %1626 = vmatpush1.bf16.msra.mxu0 %v4374_v59 }
 0x29f   :  { %1669 = vmatpush1.bf16.msra.mxu1 %v4182_v60  ;;  %v4378_v60 = vld [vmem:[#allocation4 + $0x64] ss:$16 sps:$4 sm:$0xff]  }
 0x2a0   :  { %1670 = vmatprep.subr.bf16.mxu1 %v4186_v61  ;;  %v4380_v61 = vld [vmem:[#allocation4 + $0x60] ss:$16 sps:$4 sm:$0xff]   ;;  %1627 = vmatprep.subr.bf16.mxu0 %v4378_v60 }
 0x2a2   :  { %1628 = vmatpush1.bf16.msra.mxu0 %v4380_v61 }
 0x2a3   :  { %1671 = vmatpush1.bf16.msra.mxu1 %v4189_v62  ;;  %v4384_v62 = vld [vmem:[#allocation4 + $0x84] ss:$16 sps:$4 sm:$0xff]  }
 0x2a4   :  { %1672 = vmatprep.subr.bf16.mxu1 %v4192_v63  ;;  %v4386_v63 = vld [vmem:[#allocation4 + $0x80] ss:$16 sps:$4 sm:$0xff]   ;;  %1629 = vmatprep.subr.bf16.mxu0 %v4384_v62 }
 0x2a6   :  { %1630 = vmatpush1.bf16.msra.mxu0 %v4386_v63 }
 0x2a7   :  { %1673 = vmatpush1.bf16.msra.mxu1 %v4195_v1  ;;  %v4389_v1 = vld [vmem:[#allocation4 + $0xa4] ss:$16 sps:$4 sm:$0xff]  }
 0x2a8   :  { %1674 = vmatprep.subr.bf16.mxu1 %v4199_v2  ;;  %v4392_v2 = vld [vmem:[#allocation4 + $0xa0] ss:$16 sps:$4 sm:$0xff]   ;;  %1631 = vmatprep.subr.bf16.mxu0 %v4389_v1 }
 0x2aa   :  { %1632 = vmatpush1.bf16.msra.mxu0 %v4392_v2 }
 0x2ab   :  { %1675 = vmatpush1.bf16.msra.mxu1 %v4202_v3  ;;  %v4395_v3 = vld [vmem:[#allocation4 + $0xc4] ss:$16 sps:$4 sm:$0xff]  }
 0x2ac   :  { %1676 = vmatprep.subr.bf16.mxu1 %v4205_v5  ;;  %v4398_v5 = vld [vmem:[#allocation4 + $0xc0] ss:$16 sps:$4 sm:$0xff]   ;;  %1633 = vmatprep.subr.bf16.mxu0 %v4395_v3 }
 0x2ae   :  { %1634 = vmatpush1.bf16.msra.mxu0 %v4398_v5 }
 0x2af   :  { %1677 = vmatpush1.bf16.msra.mxu1 %v4208_v6  ;;  %v4401_v6 = vld [vmem:[#allocation4 + $0xe4] ss:$16 sps:$4 sm:$0xff]  }
 0x2b0   :  { %1635 = vmatprep.subr.bf16.mxu0 %v4401_v6  ;;  %1974 = vmatprep.subr.bf16.mxu1 %v4439_v38 }
 0x2b2   :  { %1636 = vmatpush1.bf16.msra.mxu0 %v4404_v39 }
 0x2b3   :  { %1933 = vmatprep.subr.bf16.mxu0 %v4360_v54 }
 0x365   :  { %v1343_v41 = vpop.f32.mrb[8].mxu0  ;;  %v1384_v9 = vpop.f32.mrb[40].mxu1 }
 0x366   :  { %v1391_v10 = vadd.f32 %v1343_v41, %v4239_v43  ;;  %v1393_v15 = vadd.f32 %v1384_v9, %v4267_v32  ;;  %v1345_v46 = vpop.f32.mrb[9].mxu0  ;;  %v1386_v28 = vpop.f32.mrb[41].mxu1  ;;  %v4471_v41 = vld [vmem:[#allocation4 + $0xa8] ss:$16 sps:$4 sm:$0xff]   ;;  %v4474_v9 = vld [vmem:[#allocation4 + $0xcc] ss:$16 sps:$4 sm:$0xff]  }
 0x367   :  { %v1392_v37 = vadd.f32 %v1345_v46, %v4241_v45  ;;  %v1394_v51 = vadd.f32 %v1386_v28, %v4269_v36  ;;  %v1347_v4 = vpop.f32.mrb[10].mxu0  ;;  %v1388_v7 = vpop.f32.mrb[42].mxu1  ;;  %v4483_v46 = vld [vmem:[#allocation4 + $0xe8] ss:$16 sps:$4 sm:$0xff]  }
 0x368   :  { %v3288_v8 = vmul.f32 -1.442695, %v1391_v10  ;;  %v1348_v11 = vpop.f32.mrb[11].mxu0  ;;  %v1389_v13 = vpop.f32.mrb[43].mxu1  ;;  %v4477_v10 = vld [vmem:[#allocation4 + $0xc8] ss:$16 sps:$4 sm:$0xff]  }
 0x369   :  { %v3289_v14 = vmul.f32 -1.442695, %v1392_v37  ;;  %v3290_v17 = vmul.f32 -1.442695, %v1394_v51  ;;  %v4683_v13 = vld [vmem:[#allocation19_spill] sm:$0xff] }
 0x36a   :  { %3731 = vpow2.f32 %v3288_v8 }
 0x36b   :  { %3733 = vpow2.f32 %v3289_v14 }
 0x36c   :  { %3735 = vpow2.f32 %v3290_v17 }
 0x36d   :  { %3737 = vtanh.f32 %v1393_v15  ;;  %v4480_v15 = vld [vmem:[#allocation4 + $0xec] ss:$16 sps:$4 sm:$0xff]  }
 0x374   :  { %v3732_v18 = vpop.eup %3731 }
 0x375   :  { %v3734_v21 = vpop.eup %3733  ;;  %v1398_v43 = vadd.f32 1.0, %v3732_v18 }
 0x376   :  { %v1404_v32 = vadd.f32 1.0, %v3734_v21  ;;  %v3736_v45 = vpop.eup %3735 }
 0x377   :  { %3739 = vrcp.f32 %v1398_v43  ;;  %v3738_v22 = vpop.eup %3737  ;;  %v1411_v29 = vadd.f32 1.0, %v3736_v45 }
 0x378   :  { %3741 = vrcp.f32 %v1404_v32 }
 0x379   :  { %3743 = vrcp.f32 %v1411_v29 }
 0x381   :  { %v3740_v36 = vpop.eup %3739 }
 0x382   :  { %v3742_v25 = vpop.eup %3741  ;;  %v1415_v26 = vmul.f32 %v3740_v36, %v3738_v22 }
 0x383   :  { %v1414_v30 = vmul.f32 %v3742_v25, %v4336_v44  ;;  %v3744_v53 = vpop.eup %3743  ;;  %v4459_v44 = vld [vmem:[#allocation4 + $0x68] ss:$16 sps:$4 sm:$0xff]  }
 0x385   :  { %v4414_v33 = vadd.f32 %v1415_v26, %v1414_v30 }
 0x387   :  { %3745 = vtanh.f32 %v4414_v33 }
 0x391   :  { %v3746_v24 = vpop.eup %3745 }
 0x392   :  { %v4417_v34 = vmul.f32 %v3746_v24, %v3744_v53 }
 0x394   :  { %v1428_v50 = vpack.c.bf16 %v4417_v34, %v4417_v34 }
 0x396   :  { %1654 = vmatmul.mubr.bf16.vlgmr.msra.gmra.mrb[12].mxu0 %v1428_v50  ;;  %1695 = vmatmul.mubr.bf16.vlgmr.msra.gmra.mrb[44].mxu1 %v1428_v50 }
 0x397   :  { %1934 = vmatpush1.bf16.msra.mxu0 %v4362_v55  ;;  %1965 = vmatprep.mubr.bf16.mxu0 %v4682_v16 }
 0x398   :  { %1935 = vmatprep.subr.bf16.mxu0 %v4366_v56  ;;  %2006 = vmatprep.mubr.bf16.mxu1 %v4682_v16 }
 0x399   :  { %1975 = vmatpush1.bf16.msra.mxu1 %v4441_v52 }
 0x39a   :  { %1976 = vmatprep.subr.bf16.mxu1 %v4445_v0 }
 0x39b   :  { %1936 = vmatpush1.bf16.msra.mxu0 %v4368_v57 }
 0x39c   :  { %1937 = vmatprep.subr.bf16.mxu0 %v4372_v58 }
 0x39d   :  { %1977 = vmatpush1.bf16.msra.mxu1 %v4447_v23 }
 0x39e   :  { %1978 = vmatprep.subr.bf16.mxu1 %v4451_v42 }
 0x39f   :  { %1938 = vmatpush1.bf16.msra.mxu0 %v4374_v59 }
 0x3a0   :  { %1939 = vmatprep.subr.bf16.mxu0 %v4378_v60 }
 0x3a1   :  { %1979 = vmatpush1.bf16.msra.mxu1 %v4453_v12 }
 0x3a2   :  { %1980 = vmatprep.subr.bf16.mxu1 %v4457_v35 }
 0x3a3   :  { %1940 = vmatpush1.bf16.msra.mxu0 %v4380_v61 }
 0x3a4   :  { %1941 = vmatprep.subr.bf16.mxu0 %v4384_v62 }
 0x3a5   :  { %1981 = vmatpush1.bf16.msra.mxu1 %v4459_v44 }
 0x3a6   :  { %1982 = vmatprep.subr.bf16.mxu1 %v4463_v27 }
 0x3a7   :  { %1942 = vmatpush1.bf16.msra.mxu0 %v4386_v63 }
 0x3a8   :  { %1943 = vmatprep.subr.bf16.mxu0 %v4389_v1 }
 0x3a9   :  { %1983 = vmatpush1.bf16.msra.mxu1 %v4465_v31 }
 0x3aa   :  { %1984 = vmatprep.subr.bf16.mxu1 %v4468_v20 }
 0x3ab   :  { %1944 = vmatpush1.bf16.msra.mxu0 %v4392_v2 }
 0x3ac   :  { %1945 = vmatprep.subr.bf16.mxu0 %v4395_v3 }
 0x3ad   :  { %1985 = vmatpush1.bf16.msra.mxu1 %v4471_v41 }
 0x3ae   :  { %1986 = vmatprep.subr.bf16.mxu1 %v4474_v9 }
 0x3af   :  { %1946 = vmatpush1.bf16.msra.mxu0 %v4398_v5 }
 0x3b0   :  { %1947 = vmatprep.subr.bf16.mxu0 %v4401_v6 }
 0x3b1   :  { %1987 = vmatpush1.bf16.msra.mxu1 %v4477_v10 }
 0x3b2   :  { %1988 = vmatprep.subr.bf16.mxu1 %v4480_v15 }
 0x3b3   :  { %1948 = vmatpush1.bf16.msra.mxu0 %v4404_v39 }
 0x3b4   :  { %2245 = vmatprep.subr.bf16.mxu0 %v4360_v54 }
 0x3b5   :  { %1989 = vmatpush1.bf16.msra.mxu1 %v4483_v46 }
 0x3b6   :  { %2286 = vmatprep.subr.bf16.mxu1 %v4439_v38 }
 0x469   :  { %v1655_v28 = vpop.f32.mrb[12].mxu0  ;;  %v1696_v37 = vpop.f32.mrb[44].mxu1 }
 0x46a   :  { %v1703_v51 = vadd.f32 %v1655_v28, %v4243_v47  ;;  %v1705_v4 = vadd.f32 %v1696_v37, %v4271_v40  ;;  %v1657_v7 = vpop.f32.mrb[13].mxu0  ;;  %v1698_v8 = vpop.f32.mrb[45].mxu1 }
 0x46b   :  { %v1704_v11 = vadd.f32 %v1657_v7, %v4245_v49  ;;  %v1706_v14 = vadd.f32 %v1698_v8, %v4683_v13  ;;  %v1659_v17 = vpop.f32.mrb[14].mxu0  ;;  %v1700_v18 = vpop.f32.mrb[46].mxu1 }
 0x46c   :  { %v3323_v21 = vmul.f32 -1.442695, %v1703_v51  ;;  %v1660_v43 = vpop.f32.mrb[15].mxu0  ;;  %v1701_v32 = vpop.f32.mrb[47].mxu1 }
 0x46d   :  { %v3324_v45 = vmul.f32 -1.442695, %v1704_v11  ;;  %v3325_v22 = vmul.f32 -1.442695, %v1706_v14  ;;  %v4684_v11 = vld [vmem:[#allocation11_spill] sm:$0xff]  ;;  %v4685_v14 = vld [vmem:[#allocation20_spill] sm:$0xff] }
 0x46e   :  { %3747 = vpow2.f32 %v3323_v21  ;;  %v4686_v43 = vld [vmem:[#allocation12_spill] sm:$0xff] }
 0x46f   :  { %3749 = vpow2.f32 %v3324_v45  ;;  %v4687_v45 = vld [vmem:[#allocation21_spill] sm:$0xff] }
 0x470   :  { %3751 = vpow2.f32 %v3325_v22 }
 0x471   :  { %3753 = vtanh.f32 %v1705_v4 }
 0x478   :  { %v3748_v36 = vpop.eup %3747 }
 0x479   :  { %v3750_v25 = vpop.eup %3749  ;;  %v1710_v47 = vadd.f32 1.0, %v3748_v36 }
 0x47a   :  { %v1716_v40 = vadd.f32 1.0, %v3750_v25  ;;  %v3752_v49 = vpop.eup %3751 }
 0x47b   :  { %3755 = vrcp.f32 %v1710_v47  ;;  %v3754_v26 = vpop.eup %3753  ;;  %v1723_v24 = vadd.f32 1.0, %v3752_v49 }
 0x47c   :  { %3757 = vrcp.f32 %v1716_v40 }
 0x47d   :  { %3759 = vrcp.f32 %v1723_v24 }
 0x485   :  { %v3756_v29 = vpop.eup %3755 }
 0x486   :  { %v3758_v30 = vpop.eup %3757  ;;  %v1727_v53 = vmul.f32 %v3756_v29, %v3754_v26 }
 0x487   :  { %v1726_v50 = vmul.f32 %v3758_v30, %v4414_v33  ;;  %v3760_v37 = vpop.eup %3759 }
 0x489   :  { %v4493_v28 = vadd.f32 %v1727_v53, %v1726_v50 }
 0x48b   :  { %3761 = vtanh.f32 %v4493_v28 }
 0x495   :  { %v3762_v51 = vpop.eup %3761 }
 0x496   :  { %v4496_v7 = vmul.f32 %v3762_v51, %v3760_v37 }
 0x498   :  { %v1740_v4 = vpack.c.bf16 %v4496_v7, %v4496_v7 }
 0x49a   :  { %1966 = vmatmul.mubr.bf16.vlgmr.msra.gmra.mrb[16].mxu0 %v1740_v4  ;;  %2007 = vmatmul.mubr.bf16.vlgmr.msra.gmra.mrb[48].mxu1 %v1740_v4 }
 0x49b   :  { %2246 = vmatpush1.bf16.msra.mxu0 %v4362_v55  ;;  %2287 = vmatpush1.bf16.msra.mxu1 %v4441_v52 }
 0x49c   :  { %2247 = vmatprep.subr.bf16.mxu0 %v4366_v56  ;;  %2288 = vmatprep.subr.bf16.mxu1 %v4445_v0 }
 0x49d   :  { %2277 = vmatprep.mubr.bf16.mxu0 %v4682_v16  ;;  %2318 = vmatprep.mubr.bf16.mxu1 %v4682_v16 }
 0x49f   :  { %2248 = vmatpush1.bf16.msra.mxu0 %v4368_v57  ;;  %2289 = vmatpush1.bf16.msra.mxu1 %v4447_v23 }
 0x4a0   :  { %2249 = vmatprep.subr.bf16.mxu0 %v4372_v58  ;;  %2290 = vmatprep.subr.bf16.mxu1 %v4451_v42 }
 0x4a3   :  { %2250 = vmatpush1.bf16.msra.mxu0 %v4374_v59  ;;  %2291 = vmatpush1.bf16.msra.mxu1 %v4453_v12 }
 0x4a4   :  { %2251 = vmatprep.subr.bf16.mxu0 %v4378_v60  ;;  %2292 = vmatprep.subr.bf16.mxu1 %v4457_v35 }
 0x4a7   :  { %2252 = vmatpush1.bf16.msra.mxu0 %v4380_v61  ;;  %2293 = vmatpush1.bf16.msra.mxu1 %v4459_v44 }
 0x4a8   :  { %2253 = vmatprep.subr.bf16.mxu0 %v4384_v62  ;;  %2294 = vmatprep.subr.bf16.mxu1 %v4463_v27 }
 0x4ab   :  { %2254 = vmatpush1.bf16.msra.mxu0 %v4386_v63  ;;  %2295 = vmatpush1.bf16.msra.mxu1 %v4465_v31 }
 0x4ac   :  { %2255 = vmatprep.subr.bf16.mxu0 %v4389_v1  ;;  %2296 = vmatprep.subr.bf16.mxu1 %v4468_v20 }
 0x4af   :  { %2256 = vmatpush1.bf16.msra.mxu0 %v4392_v2  ;;  %2297 = vmatpush1.bf16.msra.mxu1 %v4471_v41 }
 0x4b0   :  { %2257 = vmatprep.subr.bf16.mxu0 %v4395_v3  ;;  %2298 = vmatprep.subr.bf16.mxu1 %v4474_v9 }
 0x4b3   :  { %2258 = vmatpush1.bf16.msra.mxu0 %v4398_v5  ;;  %2299 = vmatpush1.bf16.msra.mxu1 %v4477_v10 }
 0x4b4   :  { %2259 = vmatprep.subr.bf16.mxu0 %v4401_v6  ;;  %2300 = vmatprep.subr.bf16.mxu1 %v4480_v15 }
 0x4b7   :  { %2260 = vmatpush1.bf16.msra.mxu0 %v4404_v39  ;;  %2301 = vmatpush1.bf16.msra.mxu1 %v4483_v46 }
 0x4b8   :  { %2557 = vmatprep.subr.bf16.mxu0 %v4360_v54  ;;  %2598 = vmatprep.subr.bf16.mxu1 %v4439_v38 }
 0x56d   :  { %v1967_v33 = vpop.f32.mrb[16].mxu0  ;;  %v2008_v8 = vpop.f32.mrb[48].mxu1 }
 0x56e   :  { %v2015_v13 = vadd.f32 %v1967_v33, %v4684_v11  ;;  %v2017_v17 = vadd.f32 %v2008_v8, %v4685_v14  ;;  %v1969_v18 = vpop.f32.mrb[17].mxu0  ;;  %v2010_v21 = vpop.f32.mrb[49].mxu1 }
 0x56f   :  { %v2016_v32 = vadd.f32 %v1969_v18, %v4686_v43  ;;  %v2018_v22 = vadd.f32 %v2010_v21, %v4687_v45  ;;  %v1971_v36 = vpop.f32.mrb[18].mxu0  ;;  %v2012_v25 = vpop.f32.mrb[50].mxu1 }
 0x570   :  { %v3358_v47 = vmul.f32 -1.442695, %v2015_v13  ;;  %v1972_v40 = vpop.f32.mrb[19].mxu0  ;;  %v2013_v49 = vpop.f32.mrb[51].mxu1 }
 0x571   :  { %v3359_v54 = vmul.f32 -1.442695, %v2016_v32  ;;  %v3360_v26 = vmul.f32 -1.442695, %v2018_v22 }
 0x572   :  { %3763 = vpow2.f32 %v3358_v47 }
 0x573   :  { %3765 = vpow2.f32 %v3359_v54 }
 0x574   :  { %3767 = vpow2.f32 %v3360_v26 }
 0x575   :  { %3769 = vtanh.f32 %v2017_v17 }
 0x57c   :  { %v3764_v29 = vpop.eup %3763 }
 0x57d   :  { %v3766_v30 = vpop.eup %3765  ;;  %v2022_v53 = vadd.f32 1.0, %v3764_v29 }
 0x57e   :  { %v2028_v24 = vadd.f32 1.0, %v3766_v30  ;;  %v3768_v50 = vpop.eup %3767 }
 0x57f   :  { %3771 = vrcp.f32 %v2022_v53  ;;  %v3770_v37 = vpop.eup %3769  ;;  %v2035_v8 = vadd.f32 1.0, %v3768_v50 }
 0x580   :  { %3773 = vrcp.f32 %v2028_v24 }
 0x581   :  { %3775 = vrcp.f32 %v2035_v8 }
 0x589   :  { %v3772_v51 = vpop.eup %3771 }
 0x58a   :  { %v3774_v4 = vpop.eup %3773  ;;  %v2039_v33 = vmul.f32 %v3772_v51, %v3770_v37 }
 0x58b   :  { %v2038_v11 = vmul.f32 %v3774_v4, %v4493_v28  ;;  %v3776_v14 = vpop.eup %3775  ;;  %v3691_v4 = vld [vmem:[#allocation6] sm:$0xff]  }
 0x58d   :  { %v4539_v13 = vadd.f32 %v2039_v33, %v2038_v11  ;;  %v4692_v11 = vld [vmem:[#allocation15_spill] sm:$0xff] }
 0x58f   :  { %3777 = vtanh.f32 %v4539_v13 }
 0x599   :  { %v3778_v18 = vpop.eup %3777 }
 0x59a   :  { %v4542_v21 = vmul.f32 %v3778_v18, %v3776_v14  ;;  %v4693_v14 = vld [vmem:[#allocation24_spill] sm:$0xff] }
 0x59c   :  { %v2052_v17 = vpack.c.bf16 %v4542_v21, %v4542_v21 }
 0x59e   :  { %2278 = vmatmul.mubr.bf16.vlgmr.msra.gmra.mrb[20].mxu0 %v2052_v17  ;;  %2319 = vmatmul.mubr.bf16.vlgmr.msra.gmra.mrb[52].mxu1 %v2052_v17 }
 0x59f   :  { %2558 = vmatpush1.bf16.msra.mxu0 %v4362_v55  ;;  %2599 = vmatpush1.bf16.msra.mxu1 %v4441_v52 }
 0x5a0   :  { %2559 = vmatprep.subr.bf16.mxu0 %v4366_v56  ;;  %2600 = vmatprep.subr.bf16.mxu1 %v4445_v0 }
 0x5a1   :  { %2589 = vmatprep.mubr.bf16.mxu0 %v4682_v16  ;;  %2630 = vmatprep.mubr.bf16.mxu1 %v4682_v16 }
 0x5a3   :  { %2560 = vmatpush1.bf16.msra.mxu0 %v4368_v57  ;;  %2601 = vmatpush1.bf16.msra.mxu1 %v4447_v23  ;;  %v4688_v57 = vld [vmem:[#allocation13_spill] sm:$0xff] }
 0x5a4   :  { %2561 = vmatprep.subr.bf16.mxu0 %v4372_v58  ;;  %2602 = vmatprep.subr.bf16.mxu1 %v4451_v42 }
 0x5a7   :  { %2562 = vmatpush1.bf16.msra.mxu0 %v4374_v59  ;;  %2603 = vmatpush1.bf16.msra.mxu1 %v4453_v12  ;;  %v4689_v59 = vld [vmem:[#allocation22_spill] sm:$0xff] }
 0x5a8   :  { %2563 = vmatprep.subr.bf16.mxu0 %v4378_v60  ;;  %2604 = vmatprep.subr.bf16.mxu1 %v4457_v35 }
 0x5ab   :  { %2564 = vmatpush1.bf16.msra.mxu0 %v4380_v61  ;;  %2605 = vmatpush1.bf16.msra.mxu1 %v4459_v44 }
 0x5ac   :  { %2565 = vmatprep.subr.bf16.mxu0 %v4384_v62  ;;  %2606 = vmatprep.subr.bf16.mxu1 %v4463_v27 }
 0x5af   :  { %2566 = vmatpush1.bf16.msra.mxu0 %v4386_v63  ;;  %2607 = vmatpush1.bf16.msra.mxu1 %v4465_v31  ;;  %v4690_v63 = vld [vmem:[#allocation14_spill] sm:$0xff] }
 0x5b0   :  { %2567 = vmatprep.subr.bf16.mxu0 %v4389_v1  ;;  %2608 = vmatprep.subr.bf16.mxu1 %v4468_v20 }
 0x5b3   :  { %2568 = vmatpush1.bf16.msra.mxu0 %v4392_v2  ;;  %2609 = vmatpush1.bf16.msra.mxu1 %v4471_v41  ;;  %v4691_v2 = vld [vmem:[#allocation23_spill] sm:$0xff] }
 0x5b4   :  { %2569 = vmatprep.subr.bf16.mxu0 %v4395_v3  ;;  %2610 = vmatprep.subr.bf16.mxu1 %v4474_v9 }
 0x5b7   :  { %2570 = vmatpush1.bf16.msra.mxu0 %v4398_v5  ;;  %2611 = vmatpush1.bf16.msra.mxu1 %v4477_v10 }
 0x5b8   :  { %2571 = vmatprep.subr.bf16.mxu0 %v4401_v6  ;;  %2612 = vmatprep.subr.bf16.mxu1 %v4480_v15 }
 0x5bb   :  { %2572 = vmatpush1.bf16.msra.mxu0 %v4404_v39  ;;  %2613 = vmatpush1.bf16.msra.mxu1 %v4483_v46 }
 0x5bc   :  { %2910 = vmatprep.subr.bf16.mxu1 %v4439_v38 }
 0x671   :  { %v2279_v55 = vpop.f32.mrb[20].mxu0  ;;  %v2320_v56 = vpop.f32.mrb[52].mxu1 }
 0x672   :  { %v2327_v58 = vadd.f32 %v2279_v55, %v4688_v57  ;;  %v2329_v60 = vadd.f32 %v2320_v56, %v4689_v59  ;;  %v2281_v61 = vpop.f32.mrb[21].mxu0  ;;  %v2322_v62 = vpop.f32.mrb[53].mxu1  ;;  %v4694_v56 = vld [vmem:[#allocation16_spill] sm:$0xff] }
 0x673   :  { %v2328_v1 = vadd.f32 %v2281_v61, %v4690_v63  ;;  %v2330_v3 = vadd.f32 %v2322_v62, %v4691_v2  ;;  %v2283_v5 = vpop.f32.mrb[22].mxu0  ;;  %v2324_v6 = vpop.f32.mrb[54].mxu1 }
 0x674   :  { %v3393_v28 = vmul.f32 -1.442695, %v2327_v58  ;;  %v2284_v39 = vpop.f32.mrb[23].mxu0  ;;  %v2325_v43 = vpop.f32.mrb[55].mxu1  ;;  %v4695_v58 = vld [vmem:[#allocation25_spill] sm:$0xff] }
 0x675   :  { %v3394_v32 = vmul.f32 -1.442695, %v2328_v1  ;;  %v3395_v38 = vmul.f32 -1.442695, %v2330_v3 }
 0x676   :  { %3779 = vpow2.f32 %v3393_v28 }
 0x677   :  { %3781 = vpow2.f32 %v3394_v32 }
 0x678   :  { %3783 = vpow2.f32 %v3395_v38 }
 0x679   :  { %3785 = vtanh.f32 %v2329_v60 }
 0x680   :  { %v3780_v45 = vpop.eup %3779 }
 0x681   :  { %v3782_v22 = vpop.eup %3781  ;;  %v2334_v36 = vadd.f32 1.0, %v3780_v45 }
 0x682   :  { %v2340_v25 = vadd.f32 1.0, %v3782_v22  ;;  %v3784_v47 = vpop.eup %3783 }
 0x683   :  { %3787 = vrcp.f32 %v2334_v36  ;;  %v3786_v40 = vpop.eup %3785  ;;  %v2347_v29 = vadd.f32 1.0, %v3784_v47 }
 0x684   :  { %3789 = vrcp.f32 %v2340_v25 }
 0x685   :  { %3791 = vrcp.f32 %v2347_v29  ;;  %v3692_v29 = vld [vmem:[#allocation6 + $0x8] sm:$0xff]  }
 0x68d   :  { %v3788_v49 = vpop.eup %3787 }
 0x68e   :  { %v3790_v54 = vpop.eup %3789  ;;  %v2351_v26 = vmul.f32 %v3788_v49, %v3786_v40 }
 0x68f   :  { %v2350_v30 = vmul.f32 %v3790_v54, %v4539_v13  ;;  %v3792_v24 = vpop.eup %3791 }
 0x691   :  { %v4584_v53 = vadd.f32 %v2351_v26, %v2350_v30  ;;  %v2989_v30 = vpack.c.bf16 %v4339_v19, %v4294_v48  ;;  %v3698_v48 = vld [vmem:[#allocation6 + $0x38] sm:$0xff]   ;;  %v2990_v19 = vpack.c.bf16 %v4496_v7, %v4417_v34 }
 0x693   :  { %3793 = vtanh.f32 %v4584_v53 }
 0x69d   :  { %v3794_v50 = vpop.eup %3793 }
 0x69e   :  { %v4587_v37 = vmul.f32 %v3794_v50, %v3792_v24  ;;  %v3694_v24 = vld [vmem:[#allocation6 + $0x18] sm:$0xff]   ;;  %v3695_v50 = vld [vmem:[#allocation6 + $0x20] sm:$0xff]  }
 0x6a0   :  { %v2364_v51 = vpack.c.bf16 %v4587_v37, %v4587_v37 }
 0x6a2   :  { %2590 = vmatmul.mubr.bf16.vlgmr.msra.gmra.mrb[24].mxu0 %v2364_v51  ;;  %2631 = vmatmul.mubr.bf16.vlgmr.msra.gmra.mrb[56].mxu1 %v2364_v51  ;;  %v3696_v51 = vld [vmem:[#allocation6 + $0x28] sm:$0xff]  }
 0x6a3   :  { %2911 = vmatpush1.bf16.msra.mxu1 %v4441_v52  ;;  %2901 = vmatprep.mubr.bf16.mxu0 %v4682_v16  ;;  %v3667_v52 = vld [vmem:[#allocation4] ss:$16 sps:$4 sm:$0xff]  }
 0x6a4   :  { %2912 = vmatprep.subr.bf16.mxu1 %v4445_v0  ;;  %2942 = vmatprep.mubr.bf16.mxu1 %v4682_v16  ;;  %v3669_v16 = vld [vmem:[#allocation4 + $0x4] ss:$16 sps:$4 sm:$0xff]  }
 0x6a5   :  { %2869 = vmatprep.subr.bf16.mxu0 %v3669_v16  ;;  %v3672_v0 = vld [vmem:[#allocation4 + $0x24] ss:$16 sps:$4 sm:$0xff]  }
 0x6a6   :  { %2870 = vmatpush1.bf16.msra.mxu0 %v3667_v52  ;;  %v3697_v16 = vld [vmem:[#allocation6 + $0x30] sm:$0xff]   ;;  %v2991_v52 = vpack.c.bf16 %v4587_v37, %v4542_v21 }
 0x6a7   :  { %2913 = vmatpush1.bf16.msra.mxu1 %v4447_v23  ;;  %v3670_v23 = vld [vmem:[#allocation4 + $0x20] ss:$16 sps:$4 sm:$0xff]   ;;  %2871 = vmatprep.subr.bf16.mxu0 %v3672_v0 }
 0x6a8   :  { %2914 = vmatprep.subr.bf16.mxu1 %v4451_v42  ;;  %v3675_v42 = vld [vmem:[#allocation4 + $0x44] ss:$16 sps:$4 sm:$0xff]  }
 0x6aa   :  { %2872 = vmatpush1.bf16.msra.mxu0 %v3670_v23 }
 0x6ab   :  { %2915 = vmatpush1.bf16.msra.mxu1 %v4453_v12  ;;  %v3673_v12 = vld [vmem:[#allocation4 + $0x40] ss:$16 sps:$4 sm:$0xff]   ;;  %2873 = vmatprep.subr.bf16.mxu0 %v3675_v42 }
 0x6ac   :  { %2916 = vmatprep.subr.bf16.mxu1 %v4457_v35  ;;  %v3678_v35 = vld [vmem:[#allocation4 + $0x64] ss:$16 sps:$4 sm:$0xff]  }
 0x6ad   :  { %v4696_v42 = vld [vmem:[#allocation17_spill] sm:$0xff] }
 0x6ae   :  { %2874 = vmatpush1.bf16.msra.mxu0 %v3673_v12 }
 0x6af   :  { %2917 = vmatpush1.bf16.msra.mxu1 %v4459_v44  ;;  %v3676_v44 = vld [vmem:[#allocation4 + $0x60] ss:$16 sps:$4 sm:$0xff]   ;;  %2875 = vmatprep.subr.bf16.mxu0 %v3678_v35 }
 0x6b0   :  { %2918 = vmatprep.subr.bf16.mxu1 %v4463_v27  ;;  %v3681_v27 = vld [vmem:[#allocation4 + $0x84] ss:$16 sps:$4 sm:$0xff]   ;;  %v4697_v35 = vld [vmem:[#allocation26_spill] sm:$0xff] }
 0x6b2   :  { %2876 = vmatpush1.bf16.msra.mxu0 %v3676_v44 }
 0x6b3   :  { %2919 = vmatpush1.bf16.msra.mxu1 %v4465_v31  ;;  %v3679_v31 = vld [vmem:[#allocation4 + $0x80] ss:$16 sps:$4 sm:$0xff]   ;;  %2877 = vmatprep.subr.bf16.mxu0 %v3681_v27 }
 0x6b4   :  { %2920 = vmatprep.subr.bf16.mxu1 %v4468_v20  ;;  %v3682_v20 = vld [vmem:[#allocation4 + $0xa0] ss:$16 sps:$4 sm:$0xff]  }
 0x6b6   :  { %2878 = vmatpush1.bf16.msra.mxu0 %v3679_v31 }
 0x6b7   :  { %2921 = vmatpush1.bf16.msra.mxu1 %v4471_v41  ;;  %v3684_v41 = vld [vmem:[#allocation4 + $0xa4] ss:$16 sps:$4 sm:$0xff]  }
 0x6b8   :  { %2922 = vmatprep.subr.bf16.mxu1 %v4474_v9  ;;  %v3687_v9 = vld [vmem:[#allocation4 + $0xc4] ss:$16 sps:$4 sm:$0xff]   ;;  %2879 = vmatprep.subr.bf16.mxu0 %v3684_v41 }
 0x6ba   :  { %2880 = vmatpush1.bf16.msra.mxu0 %v3682_v20  ;;  %v4698_v20 = vld [vmem:[#allocation18_spill] sm:$0xff] }
 0x6bb   :  { %2923 = vmatpush1.bf16.msra.mxu1 %v4477_v10  ;;  %v3685_v10 = vld [vmem:[#allocation4 + $0xc0] ss:$16 sps:$4 sm:$0xff]   ;;  %2881 = vmatprep.subr.bf16.mxu0 %v3687_v9 }
 0x6bc   :  { %2924 = vmatprep.subr.bf16.mxu1 %v4480_v15  ;;  %v3690_v15 = vld [vmem:[#allocation4 + $0xe4] ss:$16 sps:$4 sm:$0xff]  }
 0x6bd   :  { %v4699_v9 = vld [vmem:[#allocation27_spill] sm:$0xff] }
 0x6be   :  { %2882 = vmatpush1.bf16.msra.mxu0 %v3685_v10 }
 0x6bf   :  { %2925 = vmatpush1.bf16.msra.mxu1 %v4483_v46  ;;  %v3688_v46 = vld [vmem:[#allocation4 + $0xe0] ss:$16 sps:$4 sm:$0xff]   ;;  %2883 = vmatprep.subr.bf16.mxu0 %v3690_v15 }
 0x6c2   :  { %2884 = vmatpush1.bf16.msra.mxu0 %v3688_v46 }
 0x6c3   :  { %3487 = vmatprep.subr.bf16.mxu0 %v3691_v4 }
 0x775   :  { %v2591_v33 = vpop.f32.mrb[24].mxu0  ;;  %v2632_v8 = vpop.f32.mrb[56].mxu1 }
 0x776   :  { %v2639_v13 = vadd.f32 %v2591_v33, %v4692_v11  ;;  %v2641_v18 = vadd.f32 %v2632_v8, %v4693_v14  ;;  %v2593_v17 = vpop.f32.mrb[25].mxu0  ;;  %v2634_v55 = vpop.f32.mrb[57].mxu1 }
 0x777   :  { %v2640_v57 = vadd.f32 %v2593_v17, %v4694_v56  ;;  %v2642_v59 = vadd.f32 %v2634_v55, %v4695_v58  ;;  %v2595_v60 = vpop.f32.mrb[26].mxu0  ;;  %v2636_v61 = vpop.f32.mrb[58].mxu1 }
 0x778   :  { %v3428_v62 = vmul.f32 -1.442695, %v2639_v13  ;;  %v2596_v63 = vpop.f32.mrb[27].mxu0  ;;  %v2637_v1 = vpop.f32.mrb[59].mxu1 }
 0x779   :  { %v3429_v2 = vmul.f32 -1.442695, %v2640_v57  ;;  %v3430_v3 = vmul.f32 -1.442695, %v2642_v59  ;;  %v3466_v59 = vld [vmem:[#allocation8] ss:$0 sm:$0xff] }
 0x77a   :  { %3795 = vpow2.f32 %v3428_v62 }
 0x77b   :  { %3797 = vpow2.f32 %v3429_v2 }
 0x77c   :  { %3799 = vpow2.f32 %v3430_v3 }
 0x77d   :  { %3801 = vtanh.f32 %v2641_v18 }
 0x784   :  { %v3796_v5 = vpop.eup %3795 }
 0x785   :  { %v3798_v6 = vpop.eup %3797  ;;  %v2646_v28 = vadd.f32 1.0, %v3796_v5 }
 0x786   :  { %v2652_v39 = vadd.f32 1.0, %v3798_v6  ;;  %v3800_v43 = vpop.eup %3799 }
 0x787   :  { %3803 = vrcp.f32 %v2646_v28  ;;  %v3802_v32 = vpop.eup %3801  ;;  %v2659_v36 = vadd.f32 1.0, %v3800_v43 }
 0x788   :  { %3805 = vrcp.f32 %v2652_v39 }
 0x789   :  { %3807 = vrcp.f32 %v2659_v36 }
 0x791   :  { %v3804_v38 = vpop.eup %3803 }
 0x792   :  { %v3806_v45 = vpop.eup %3805  ;;  %v2663_v22 = vmul.f32 %v3804_v38, %v3802_v32 }
 0x793   :  { %v2662_v25 = vmul.f32 %v3806_v45, %v4584_v53  ;;  %v3808_v40 = vpop.eup %3807  ;;  %v3693_v53 = vld [vmem:[#allocation6 + $0x10] sm:$0xff]  }
 0x795   :  { %v4613_v47 = vadd.f32 %v2663_v22, %v2662_v25 }
 0x797   :  { %3809 = vtanh.f32 %v4613_v47 }
 0x7a1   :  { %v3810_v49 = vpop.eup %3809 }
 0x7a2   :  { %v4616_v54 = vmul.f32 %v3810_v49, %v3808_v40 }
 0x7a4   :  { %v2676_v26 = vpack.c.bf16 %v4616_v54, %v4616_v54 }
 0x7a6   :  { %2902 = vmatmul.mubr.bf16.vlgmr.msra.gmra.mrb[28].mxu0 %v2676_v26  ;;  %2943 = vmatmul.mubr.bf16.vlgmr.msra.gmra.mrb[60].mxu1 %v2676_v26 }
 0x7a7   :  { %3488 = vmatpush3.bf16.msra.mxu0 %v3691_v4  ;;  %3503 = vmatprep.mubr.bf16.mxu0 %v2989_v30 }
 0x7a8   :  { %3489 = vmatprep.subr.bf16.mxu0 %v3692_v29 }
 0x7ab   :  { %3490 = vmatpush3.bf16.msra.mxu0 %v3692_v29 }
 0x7ac   :  { %3491 = vmatprep.subr.bf16.mxu0 %v3693_v53 }
 0x7af   :  { %3492 = vmatpush3.bf16.msra.mxu0 %v3693_v53 }
 0x7b0   :  { %3493 = vmatprep.subr.bf16.mxu0 %v3694_v24 }
 0x7b3   :  { %3494 = vmatpush3.bf16.msra.mxu0 %v3694_v24 }
 0x7b4   :  { %3495 = vmatprep.subr.bf16.mxu0 %v3695_v50 }
 0x7b7   :  { %3496 = vmatpush3.bf16.msra.mxu0 %v3695_v50 }
 0x7b8   :  { %3497 = vmatprep.subr.bf16.mxu0 %v3696_v51 }
 0x7bb   :  { %3498 = vmatpush3.bf16.msra.mxu0 %v3696_v51 }
 0x7bc   :  { %3499 = vmatprep.subr.bf16.mxu0 %v3697_v16 }
 0x7bf   :  { %3500 = vmatpush3.bf16.msra.mxu0 %v3697_v16 }
 0x7c0   :  { %3501 = vmatprep.subr.bf16.mxu0 %v3698_v48 }
 0x7c3   :  { %3502 = vmatpush3.bf16.msra.mxu0 %v3698_v48 }
 0x7c6   :  { %3504 = vmatmul.mubr.bf16.vlgmr.msra.gmra.mrb[32].mxu0 %v2990_v19 }
 0x7c7   :  { %3507 = vmatprep.mubr.bf16.mxu0 %v2991_v52 }
 0x879   :  { %v2903_v0 = vpop.f32.mrb[28].mxu0  ;;  %v2944_v23 = vpop.f32.mrb[60].mxu1 }
 0x87a   :  { %v2951_v12 = vadd.f32 %v2903_v0, %v4696_v42  ;;  %v2953_v44 = vadd.f32 %v2944_v23, %v4697_v35  ;;  %v2905_v27 = vpop.f32.mrb[29].mxu0  ;;  %v2946_v31 = vpop.f32.mrb[61].mxu1 }
 0x87b   :  { %v2952_v41 = vadd.f32 %v2905_v27, %v4698_v20  ;;  %v2954_v10 = vadd.f32 %v2946_v31, %v4699_v9  ;;  %v2907_v15 = vpop.f32.mrb[30].mxu0  ;;  %v2948_v46 = vpop.f32.mrb[62].mxu1 }
 0x87c   :  { %v3463_v34 = vmul.f32 -1.442695, %v2951_v12  ;;  %v2908_v7 = vpop.f32.mrb[31].mxu0  ;;  %v2949_v4 = vpop.f32.mrb[63].mxu1 }
 0x87d   :  { %v3464_v21 = vmul.f32 -1.442695, %v2952_v41  ;;  %v3465_v37 = vmul.f32 -1.442695, %v2954_v10 }
 0x87e   :  { %3811 = vpow2.f32 %v3463_v34 }
 0x87f   :  { %3813 = vpow2.f32 %v3464_v21 }
 0x880   :  { %3815 = vpow2.f32 %v3465_v37 }
 0x881   :  { %3817 = vtanh.f32 %v2953_v44 }
 0x888   :  { %v3812_v33 = vpop.eup %3811 }
 0x889   :  { %v3814_v8 = vpop.eup %3813  ;;  %v2958_v11 = vadd.f32 1.0, %v3812_v33 }
 0x88a   :  { %v2964_v13 = vadd.f32 1.0, %v3814_v8  ;;  %v3816_v14 = vpop.eup %3815 }
 0x88b   :  { %3819 = vrcp.f32 %v2958_v11  ;;  %v3818_v18 = vpop.eup %3817  ;;  %v2971_v57 = vadd.f32 1.0, %v3816_v14 }
 0x88c   :  { %3821 = vrcp.f32 %v2964_v13 }
 0x88d   :  { %3823 = vrcp.f32 %v2971_v57 }
 0x895   :  { %v3820_v17 = vpop.eup %3819 }
 0x896   :  { %v3822_v55 = vpop.eup %3821  ;;  %v2975_v56 = vmul.f32 %v3820_v17, %v3818_v18 }
 0x897   :  { %v2974_v58 = vmul.f32 %v3822_v55, %v4613_v47  ;;  %v3824_v28 = vpop.eup %3823 }
 0x899   :  { %v3505_v60 = vpop.f32.mrb[32].mxu0  ;;  %v2976_v61 = vadd.f32 %v2975_v56, %v2974_v58 }
 0x89a   :  { %v3107_v62 = vadd.f32 %v3505_v60, %v3466_v59  ;;  %v3098_v63 = vpop.f32.mrb[33].mxu0 }
 0x89b   :  { %v3099_v1 = vadd.f32 %v3466_v59, %v3098_v63  ;;  %v3506_v2 = vpop.f32.mrb[34].mxu0  ;;  %3825 = vtanh.f32 %v2976_v61 }
 0x89c   :  { %3131 = vst [vmem:[%s4662_s6 + $0x10] sm:$0xff] %v3107_v62  ;;  %v3110_v3 = vadd.f32 %v3506_v2, %v3466_v59  ;;  %v3101_v5 = vpop.f32.mrb[35].mxu0 }
 0x89d   :  { %3129 = vst [vmem:[%s4662_s6] sm:$0xff] %v3099_v1  ;;  %v3102_v6 = vadd.f32 %v3466_v59, %v3101_v5 }
 0x89e   :  { %3132 = vst [vmem:[%s4662_s6 + $0x18] sm:$0xff] %v3110_v3 }
 0x89f   :  { %3130 = vst [vmem:[%s4662_s6 + $0x8] sm:$0xff] %v3102_v6 }
 0x8a5   :  { %v3826_v39 = vpop.eup %3825 }
 0x8a6   :  { %v2978_v43 = vmul.f32 %v3826_v39, %v3824_v28 }
 0x8a8   :  { %v2992_v32 = vpack.c.bf16 %v2978_v43, %v4616_v54 }
 0x8aa   :  { %3508 = vmatmul.mubr.bf16.gmra.mrb[36].mxu0 %v2992_v32 }
 0x97d   :  { %v3509_v38 = vpop.f32.mrb[36].mxu0 }
 0x97e   :  { %v3123_v45 = vadd.f32 %v3509_v38, %v3466_v59  ;;  %v3114_v22 = vpop.f32.mrb[37].mxu0 }
 0x97f   :  { %v3115_v36 = vadd.f32 %v3466_v59, %v3114_v22  ;;  %v3510_v25 = vpop.f32.mrb[38].mxu0 }
 0x980   :  { %3135 = vst [vmem:[%s4662_s6 + $0x30] sm:$0xff] %v3123_v45  ;;  %v3126_v47 = vadd.f32 %v3510_v25, %v3466_v59  ;;  %v3117_v40 = vpop.f32.mrb[39].mxu0 }
 0x981   :  { %3133 = vst [vmem:[%s4662_s6 + $0x20] sm:$0xff] %v3115_v36  ;;  %v3118_v49 = vadd.f32 %v3466_v59, %v3117_v40 }
 0x982   :  { %3136 = vst [vmem:[%s4662_s6 + $0x38] sm:$0xff] %v3126_v47 }
 0x983   :  { %3134 = vst [vmem:[%s4662_s6 + $0x28] sm:$0xff] %v3118_v49 }
 0x984   :  { %3141 = vsyncpa [#allocation5], 1 }
 0x985   :  { %3142 = vsyncpa [#allocation7], 1 }

</bundles_post_ra>
